<compile_context>
chip_gen: v7x
topology: tpu7x:2x2x1
jax: 0.10.0
libtpu: 0.0.40
codegen_flags: <defaults>
</compile_context>

<pallas_src>
import functools

import numpy as np
import jax
import jax.numpy as jnp
from jax import lax
from jax.experimental import pallas as pl
from jax.experimental.pallas import tpu as pltpu


def _upsample_kernel(x_ref, *refs, num_stages, K, up, nb, dims):
    """Fully fused Upsample forward for `nb` batch images per grid step.

    x_ref      : (nb, H0, W0*C0) f32      input activations, flattened (H, W*C)
    per stage s (3 refs each):
      wrow_ref : (K*Lp_in, L_out) bf16    conv (+W-upsample) weights, K vertical
                                          taps concatenated along the contraction
      aff_ref  : (3, L_out)       f32     [conv bias ; BN scale ; BN shift]
      rrep_ref : (up*Hs, Hs)      f32     0/1 nearest row-replication matrix
    out_ref    : (nb, H_out, W_out*C_out) f32, lane-dense
    stage_refs : per-stage bf16 VMEM staging (nb*Hs, K*Lp_in); band t holds the
                 activation shifted by (t - pad) rows, zero rows/lanes are the
                 conv halo / lane padding.
    """
    param_refs = refs[:3 * num_stages]
    out_ref = refs[3 * num_stages]
    stage_refs = refs[3 * num_stages + 1:]
    pad = K // 2

    def write_stage_rows(s, img, act):
        """Build the K shifted, lane-padded bands for image `img` in vregs and
        store them as ONE aligned, full-width block into stage s's staging."""
        Hs, L_in, Lp, _ = dims[s]
        a = act.astype(jnp.float32)
        if Lp > L_in:                      # lane-pad to a multiple of 128
            a = jnp.concatenate(
                [a, jnp.zeros((Hs, Lp - L_in), jnp.float32)], axis=1)
        bands = []
        for t in range(K):                 # band t holds x[h + t - pad]
            d = t - pad
            if d == 0:
                bands.append(a)
            elif d > 0:
                bands.append(jnp.concatenate(
                    [a[d:, :], jnp.zeros((d, Lp), jnp.float32)], axis=0))
            else:
                bands.append(jnp.concatenate(
                    [jnp.zeros((-d, Lp), jnp.float32), a[:Hs + d, :]], axis=0))
        block = jnp.concatenate(bands, axis=1).astype(jnp.bfloat16)
        stage_refs[s][img * Hs:(img + 1) * Hs, :] = block

    # Stage-0 staging straight from the input block (every row is rewritten
    # each grid step, so no stale-scratch hazard and no explicit halo zeroing).
    for img in range(nb):
        write_stage_rows(0, img, x_ref[img, :, :])

    for s in range(num_stages):
        Hs, _, _, L_out = dims[s]
        wrow_ref = param_refs[3 * s]
        aff_ref = param_refs[3 * s + 1]
        rrep_ref = param_refs[3 * s + 2]

        # Conv3x3 (+ nearest W-upsample folded into the weights): ONE bf16 MXU
        # matmul over all nb images, f32 accumulation.
        acc = jnp.dot(stage_refs[s][...], wrow_ref[...],
                      preferred_element_type=jnp.float32)      # (nb*Hs, L_out)
        y = jnp.maximum(acc + aff_ref[0:1, :], 0.0)            # conv bias + ReLU
        y = y * aff_ref[1:2, :] + aff_ref[2:3, :]              # BatchNorm2d (eval)
        # Dropout: identity in eval mode.
        # TODO(synk): train-mode Dropout / BatchNorm batch statistics are not
        # implemented (eval-mode forward only).

        # Nearest H-upsample done per image (chunking bounds f32 live ranges),
        # result either staged for the next stage or stored lane-dense.
        for img in range(nb):
            y_img = y[img * Hs:(img + 1) * Hs, :]
            y_up = jnp.dot(rrep_ref[...], y_img,
                           preferred_element_type=jnp.float32)  # (up*Hs, L_out)
            if s + 1 < num_stages:
                write_stage_rows(s + 1, img, y_up)
            else:
                out_ref[img, :, :] = y_up


def _round_up(v, m):
    return -(-v // m) * m


def _fold_stage(w_hwio, bias, bn_scale, bn_shift, Hs, Ws, up):
    """Host-side weight folding for one stage (runs once).

    Returns:
      wrow : (K*Lp_in, L_out) bf16  conv taps concatenated along contraction,
             with zero W-padding, lane padding and nearest W-upsample baked in.
      aff  : (3, L_out)       f32   conv bias / BN scale / BN shift, tiled to
             the flattened (W*C) lane axis.
      rrep : (up*Hs, Hs)      f32   0/1 nearest row-replication matrix.
    """
    w = np.asarray(w_hwio, dtype=np.float32)          # (K, K, Cin, Cout) HWIO
    K, _, Cin, Cout = w.shape
    pad = K // 2
    L_in = Ws * Cin
    Lp = _round_up(L_in, 128)
    L_out = up * Ws * Cout

    wrow = np.zeros((K * Lp, L_out), np.float32)
    for t in range(K):                                # vertical tap / band
        base = t * Lp
        for wo in range(Ws):                          # output col (pre-upsample)
            for dx in range(K):
                wi = wo + dx - pad                    # input col (zero halo if OOR)
                if 0 <= wi < Ws:
                    rows = slice(base + wi * Cin, base + (wi + 1) * Cin)
                    for r in range(up):               # nearest W replication
                        c0 = (up * wo + r) * Cout
                        wrow[rows, c0:c0 + Cout] = w[t, dx]

    aff = np.stack([
        np.tile(np.asarray(bias, np.float32), up * Ws),
        np.tile(np.asarray(bn_scale, np.float32), up * Ws),
        np.tile(np.asarray(bn_shift, np.float32), up * Ws),
    ]).astype(np.float32)                             # (3, L_out)

    rrep = np.repeat(np.eye(Hs, dtype=np.float32), up, axis=0)   # (up*Hs, Hs)
    return (jnp.asarray(wrow, jnp.bfloat16),
            jnp.asarray(aff, jnp.float32),
            jnp.asarray(rrep, jnp.float32))


def prepare_upsample(params, in_shape, *, scale_factor=2, batch_block=None):
    """Fold the weights ONCE and build a jitted forward fn.

    Returns (forward, folded_args); call as forward(x_nchw, *folded_args).
    """
    N, C0, H, W = in_shape
    up = scale_factor
    K = params[0]["w"].shape[0]
    num_stages = len(params)

    # Images per grid step: keep the grid a multiple of 2 when possible so
    # both v7x TensorCores get work, while still raising the matmul M dim.
    if batch_block is None:
        nb = max(1, N // 2) if N % 2 == 0 else 1
        nb = min(nb, 8)
    else:
        nb = max(1, batch_block)
    while N % nb:
        nb -= 1

    dims, folded = [], []
    h, w_sz, cin = H, W, C0
    for p in params:
        cout = p["w"].shape[-1]
        L_in = w_sz * cin
        Lp = _round_up(L_in, 128)
        L_out = up * w_sz * cout
        dims.append((h, L_in, Lp, L_out))
        folded += list(_fold_stage(p["w"], p["b"], p["bn_scale"],
                                   p["bn_shift"], h, w_sz, up))
        h, w_sz, cin = up * h, up * w_sz, cout
    H_out, W_out, C_out = h, w_sz, cin
    dims = tuple(dims)
    folded = tuple(folded)

    # VMEM size guard: the folded-weight scheme is O(W^2); above this budget a
    # W-tiled true-conv (per-tap Cin x Cout matmul) fallback would be needed.
    param_bytes = sum(int(np.prod(a.shape)) * a.dtype.itemsize for a in folded)
    scratch_bytes = sum(nb * Hs * K * Lp * 2 for (Hs, _l, Lp, _o) in dims)
    io_bytes = 2 * 4 * (nb * H * W * C0 + nb * H_out * W_out * C_out)
    if 2 * param_bytes + scratch_bytes + io_bytes > 48 * 1024 * 1024:
        raise NotImplementedError(
            "Folded-weight Upsample kernel exceeds the VMEM budget at this "
            "feature-map size; a W-tiled true-conv fallback is required.")

    # Advisory cost estimate so XLA can overlap this small kernel.
    flops = 0
    for (Hs, _l, Lp, L_out) in dims:
        flops += N * (2 * Hs * (K * Lp) * L_out + 2 * (up * Hs) * Hs * L_out)
    bytes_accessed = ((N // nb) * param_bytes
                      + N * H * W * C0 * 4 + N * H_out * W_out * C_out * 4)
    cost = pl.CostEstimate(flops=int(flops), transcendentals=0,
                           bytes_accessed=int(bytes_accessed))

    in_specs = [pl.BlockSpec((nb, H, W * C0), lambda n: (n, 0, 0))]
    for (Hs, _l, Lp, L_out) in dims:
        # Grid-invariant parameters (constant index maps); pl.Buffered(1)
        # would halve their VMEM but is unnecessary at these sizes.
        in_specs.append(pl.BlockSpec((K * Lp, L_out), lambda n: (0, 0)))
        in_specs.append(pl.BlockSpec((3, L_out), lambda n: (0, 0)))
        in_specs.append(pl.BlockSpec((up * Hs, Hs), lambda n: (0, 0)))
    out_spec = pl.BlockSpec((nb, H_out, W_out * C_out), lambda n: (n, 0, 0))
    scratch_shapes = [pltpu.VMEM((nb * Hs, K * Lp), jnp.bfloat16)
                      for (Hs, _l, Lp, _o) in dims]

    call = pl.pallas_call(
        functools.partial(_upsample_kernel, num_stages=num_stages, K=K,
                          up=up, nb=nb, dims=dims),
        out_shape=jax.ShapeDtypeStruct((N, H_out, W_out * C_out), jnp.float32),
        grid=(N // nb,),
        in_specs=in_specs,
        out_specs=out_spec,
        scratch_shapes=scratch_shapes,
        compiler_params=pltpu.CompilerParams(
            dimension_semantics=("parallel",)),
        cost_estimate=cost,
    )

    def forward(x_nchw, *stage_args):
        # NCHW -> lane-dense flattened NHWC (tiny, fused under jit).
        x_flat = jnp.transpose(x_nchw, (0, 2, 3, 1)).reshape(N, H, W * C0)
        out = call(x_flat, *stage_args)
        return jnp.transpose(out.reshape(N, H_out, W_out, C_out), (0, 3, 1, 2))

    return jax.jit(forward), folded


def init_params(key, in_channels, out_channels, num_stages, kernel_size=3):
    """Deterministic synthetic parameters matching the module's shapes."""
    params = []
    cin = in_channels
    eps = 1e-5
    for _ in range(num_stages):
        key, k1, k2, k3, k4 = jax.random.split(key, 5)
        # PyTorch Conv2d weight is OIHW; convert to HWIO for the NHWC math.
        w_oihw = 0.1 * jax.random.normal(
            k1, (out_channels, cin, kernel_size, kernel_size), jnp.float32)
        w = jnp.transpose(w_oihw, (2, 3, 1, 0))
        b = 0.05 * jax.random.normal(k2, (out_channels,), jnp.float32)
        gamma = 1.0 + 0.1 * jax.random.normal(k3, (out_channels,), jnp.float32)
        beta = 0.1 * jax.random.normal(k4, (out_channels,), jnp.float32)
        running_mean = jnp.zeros((out_channels,), jnp.float32)
        running_var = jnp.ones((out_channels,), jnp.float32)
        bn_scale = gamma / jnp.sqrt(running_var + eps)
        bn_shift = beta - running_mean * bn_scale
        params.append(dict(w=w, b=b, bn_scale=bn_scale, bn_shift=bn_shift))
        cin = out_channels
    return params


def upsample_reference(x_nchw, params, *, scale_factor=2):
    """Plain-JAX f32 reference (lax.conv) for correctness checking."""
    out = jnp.transpose(x_nchw, (0, 2, 3, 1))
    for p in params:
        y = lax.conv_general_dilated(
            out, p["w"], window_strides=(1, 1), padding=((1, 1), (1, 1)),
            dimension_numbers=("NHWC", "HWIO", "NHWC"))
        y = y + p["b"][None, None, None, :]
        y = jnp.maximum(y, 0.0)
        y = y * p["bn_scale"][None, None, None, :] + p["bn_shift"][None, None, None, :]
        y = jnp.repeat(jnp.repeat(y, scale_factor, axis=1), scale_factor, axis=2)
        out = y
    return jnp.transpose(out, (0, 3, 1, 2))


if __name__ == "__main__":
    key = jax.random.PRNGKey(0)
    kx, kp, kx2 = jax.random.split(key, 3)

    # Upsample(in_channels=4, out_channels=8, num_stages=2, scale_factor=2)
    N, Cin, H, W = 2, 4, 16, 16
    Cout, num_stages, scale_factor = 8, 2, 2

    x = jax.random.normal(kx, (N, Cin, H, W), jnp.float32)
    params = init_params(kp, Cin, Cout, num_stages)

    fwd, folded = prepare_upsample(params, x.shape, scale_factor=scale_factor)
    out = jax.block_until_ready(fwd(x, *folded))
    ref = jax.block_until_ready(
        upsample_reference(x, params, scale_factor=scale_factor))

    expected_shape = (N, Cout, H * scale_factor ** num_stages,
                      W * scale_factor ** num_stages)
    assert out.shape == expected_shape, (out.shape, expected_shape)
    # bf16 conv operands (weights + staged activations) give ~1e-3 relative
    # error vs. the pure-f32 reference; 1e-2 still flags any structural bug.
    assert jnp.allclose(out, ref, rtol=1e-2, atol=1e-2), \
        float(jnp.max(jnp.abs(out - ref)))

    # Also exercise the multi-image-per-grid-step path (nb=2, grid=(2,)).
    x4 = jax.random.normal(kx2, (4, Cin, H, W), jnp.float32)
    fwd4, folded4 = prepare_upsample(params, x4.shape, scale_factor=scale_factor)
    out4 = jax.block_until_ready(fwd4(x4, *folded4))
    ref4 = upsample_reference(x4, params, scale_factor=scale_factor)
    assert jnp.allclose(out4, ref4, rtol=1e-2, atol=1e-2), \
        float(jnp.max(jnp.abs(out4 - ref4)))

    print("KERNEL_OK")
</pallas_src>

<mosaic_0001>
module attributes {stable_mosaic.version = 11 : i64} {
  func.func @_upsample_kernel(%arg0: i32, %arg1: memref<1x16x64xf32, #tpu.memory_space<vmem>>, %arg2: memref<384x256xbf16, #tpu.memory_space<vmem>>, %arg3: memref<3x256xf32, #tpu.memory_space<vmem>>, %arg4: memref<32x16xf32, #tpu.memory_space<vmem>>, %arg5: memref<768x512xbf16, #tpu.memory_space<vmem>>, %arg6: memref<3x512xf32, #tpu.memory_space<vmem>>, %arg7: memref<64x32xf32, #tpu.memory_space<vmem>>, %arg8: memref<1x64x512xf32, #tpu.memory_space<vmem>>, %arg9: memref<16x384xbf16, #tpu.memory_space<vmem>>, %arg10: memref<32x768xbf16, #tpu.memory_space<vmem>>) attributes {dimension_semantics = [#tpu.dimension_semantics<parallel>], iteration_bounds = array<i64: 2>, scalar_prefetch = 0 : i64, scratch_operands = 2 : i64, tpu.core_type = #tpu.core_type<tc>, window_params = [{transform_indices = @transform_0, window_bounds = array<i64: 1, 16, 64>}, {pipeline_mode = #tpu.pipeline_mode<synchronous>, transform_indices = @transform_1, window_bounds = array<i64: 384, 256>}, {pipeline_mode = #tpu.pipeline_mode<synchronous>, transform_indices = @transform_2, window_bounds = array<i64: 3, 256>}, {pipeline_mode = #tpu.pipeline_mode<synchronous>, transform_indices = @transform_3, window_bounds = array<i64: 32, 16>}, {pipeline_mode = #tpu.pipeline_mode<synchronous>, transform_indices = @transform_4, window_bounds = array<i64: 768, 512>}, {pipeline_mode = #tpu.pipeline_mode<synchronous>, transform_indices = @transform_5, window_bounds = array<i64: 3, 512>}, {pipeline_mode = #tpu.pipeline_mode<synchronous>, transform_indices = @transform_6, window_bounds = array<i64: 64, 32>}, {transform_indices = @transform_7, window_bounds = array<i64: 1, 64, 512>}]} {
    %c0 = arith.constant 0 : index
    %c0_0 = arith.constant 0 : index
    %c0_1 = arith.constant 0 : index
    %0 = vector.load %arg1[%c0, %c0_0, %c0_1] : memref<1x16x64xf32, #tpu.memory_space<vmem>>, vector<1x16x64xf32>
    %1 = vector.shape_cast %0 : vector<1x16x64xf32> to vector<16x64xf32>
    %cst = arith.constant 0.000000e+00 : f32
    %2 = vector.broadcast %cst : f32 to vector<16x64xf32>
    %3 = tpu.concatenate %1, %2 in 1 : vector<16x64xf32>, vector<16x64xf32> -> vector<16x128xf32>
    %cst_2 = arith.constant 0.000000e+00 : f32
    %4 = vector.broadcast %cst_2 : f32 to vector<1x128xf32>
    %5 = vector.extract_strided_slice %3 {offsets = [0, 0], sizes = [15, 128], strides = [1, 1]} : vector<16x128xf32> to vector<15x128xf32>
    %6 = tpu.concatenate %4, %5 in 0 : vector<1x128xf32>, vector<15x128xf32> -> vector<16x128xf32>
    %7 = vector.extract_strided_slice %3 {offsets = [1, 0], sizes = [15, 128], strides = [1, 1]} : vector<16x128xf32> to vector<15x128xf32>
    %cst_3 = arith.constant 0.000000e+00 : f32
    %8 = vector.broadcast %cst_3 : f32 to vector<1x128xf32>
    %9 = tpu.concatenate %7, %8 in 0 : vector<15x128xf32>, vector<1x128xf32> -> vector<16x128xf32>
    %10 = tpu.concatenate %6, %3, %9 in 1 : vector<16x128xf32>, vector<16x128xf32>, vector<16x128xf32> -> vector<16x384xf32>
    %11 = arith.truncf %10 : vector<16x384xf32> to vector<16x384xbf16>
    %c0_4 = arith.constant 0 : index
    %c0_5 = arith.constant 0 : index
    %12 = vector.load %arg9[%c0_4, %c0_5] : memref<16x384xbf16, #tpu.memory_space<vmem>>, vector<16x384xbf16>
    tpu.vector_store %arg9[%c0_4, %c0_5], %11 {strides = array<i32>} : memref<16x384xbf16, #tpu.memory_space<vmem>>, vector<16x384xbf16>,
    %c0_6 = arith.constant 0 : index
    %c0_7 = arith.constant 0 : index
    %13 = vector.load %arg9[%c0_6, %c0_7] : memref<16x384xbf16, #tpu.memory_space<vmem>>, vector<16x384xbf16>
    %c0_8 = arith.constant 0 : index
    %c0_9 = arith.constant 0 : index
    %14 = vector.load %arg2[%c0_8, %c0_9] : memref<384x256xbf16, #tpu.memory_space<vmem>>, vector<384x256xbf16>
    %cst_10 = arith.constant dense<0.000000e+00> : vector<16x256xf32>
    %15 = tpu.matmul %13, %14, %cst_10 {dimension_numbers = #tpu.dot_dimension_numbers<[1], [0], [0], [1], [0, 0, 1, 1], [], []>} : vector<16x384xbf16>, vector<384x256xbf16>, vector<16x256xf32> -> vector<16x256xf32>
    %c0_11 = arith.constant 0 : index
    %c0_12 = arith.constant 0 : index
    %16 = vector.load %arg3[%c0_11, %c0_12] : memref<3x256xf32, #tpu.memory_space<vmem>>, vector<1x256xf32>
    %17 = vector.broadcast %16 : vector<1x256xf32> to vector<16x256xf32>
    %18 = arith.addf %15, %17 : vector<16x256xf32>
    %cst_13 = arith.constant 0.000000e+00 : f32
    %19 = vector.broadcast %cst_13 : f32 to vector<16x256xf32>
    %20 = arith.maximumf %18, %19 : vector<16x256xf32>
    %c1 = arith.constant 1 : index
    %c0_14 = arith.constant 0 : index
    %21 = vector.load %arg3[%c1, %c0_14] : memref<3x256xf32, #tpu.memory_space<vmem>>, vector<1x256xf32>
    %22 = vector.broadcast %21 : vector<1x256xf32> to vector<16x256xf32>
    %23 = arith.mulf %20, %22 : vector<16x256xf32>
    %c2 = arith.constant 2 : index
    %c0_15 = arith.constant 0 : index
    %24 = vector.load %arg3[%c2, %c0_15] : memref<3x256xf32, #tpu.memory_space<vmem>>, vector<1x256xf32>
    %25 = vector.broadcast %24 : vector<1x256xf32> to vector<16x256xf32>
    %26 = arith.addf %23, %25 : vector<16x256xf32>
    %c0_16 = arith.constant 0 : index
    %c0_17 = arith.constant 0 : index
    %27 = vector.load %arg4[%c0_16, %c0_17] : memref<32x16xf32, #tpu.memory_space<vmem>>, vector<32x16xf32>
    %cst_18 = arith.constant dense<0.000000e+00> : vector<32x256xf32>
    %28 = tpu.matmul %27, %26, %cst_18 {dimension_numbers = #tpu.dot_dimension_numbers<[1], [0], [0], [1], [0, 0, 1, 1], [], []>} : vector<32x16xf32>, vector<16x256xf32>, vector<32x256xf32> -> vector<32x256xf32>
    %cst_19 = arith.constant 0.000000e+00 : f32
    %29 = vector.broadcast %cst_19 : f32 to vector<1x256xf32>
    %30 = vector.extract_strided_slice %28 {offsets = [0, 0], sizes = [31, 256], strides = [1, 1]} : vector<32x256xf32> to vector<31x256xf32>
    %31 = tpu.concatenate %29, %30 in 0 : vector<1x256xf32>, vector<31x256xf32> -> vector<32x256xf32>
    %32 = vector.extract_strided_slice %28 {offsets = [1, 0], sizes = [31, 256], strides = [1, 1]} : vector<32x256xf32> to vector<31x256xf32>
    %cst_20 = arith.constant 0.000000e+00 : f32
    %33 = vector.broadcast %cst_20 : f32 to vector<1x256xf32>
    %34 = tpu.concatenate %32, %33 in 0 : vector<31x256xf32>, vector<1x256xf32> -> vector<32x256xf32>
    %35 = tpu.concatenate %31, %28, %34 in 1 : vector<32x256xf32>, vector<32x256xf32>, vector<32x256xf32> -> vector<32x768xf32>
    %36 = arith.truncf %35 : vector<32x768xf32> to vector<32x768xbf16>
    %c0_21 = arith.constant 0 : index
    %c0_22 = arith.constant 0 : index
    %37 = vector.load %arg10[%c0_21, %c0_22] : memref<32x768xbf16, #tpu.memory_space<vmem>>, vector<32x768xbf16>
    tpu.vector_store %arg10[%c0_21, %c0_22], %36 {strides = array<i32>} : memref<32x768xbf16, #tpu.memory_space<vmem>>, vector<32x768xbf16>,
    %c0_23 = arith.constant 0 : index
    %c0_24 = arith.constant 0 : index
    %38 = vector.load %arg10[%c0_23, %c0_24] : memref<32x768xbf16, #tpu.memory_space<vmem>>, vector<32x768xbf16>
    %c0_25 = arith.constant 0 : index
    %c0_26 = arith.constant 0 : index
    %39 = vector.load %arg5[%c0_25, %c0_26] : memref<768x512xbf16, #tpu.memory_space<vmem>>, vector<768x512xbf16>
    %cst_27 = arith.constant dense<0.000000e+00> : vector<32x512xf32>
    %40 = tpu.matmul %38, %39, %cst_27 {dimension_numbers = #tpu.dot_dimension_numbers<[1], [0], [0], [1], [0, 0, 1, 1], [], []>} : vector<32x768xbf16>, vector<768x512xbf16>, vector<32x512xf32> -> vector<32x512xf32>
    %c0_28 = arith.constant 0 : index
    %c0_29 = arith.constant 0 : index
    %41 = vector.load %arg6[%c0_28, %c0_29] : memref<3x512xf32, #tpu.memory_space<vmem>>, vector<1x512xf32>
    %42 = vector.broadcast %41 : vector<1x512xf32> to vector<32x512xf32>
    %43 = arith.addf %40, %42 : vector<32x512xf32>
    %cst_30 = arith.constant 0.000000e+00 : f32
    %44 = vector.broadcast %cst_30 : f32 to vector<32x512xf32>
    %45 = arith.maximumf %43, %44 : vector<32x512xf32>
    %c1_31 = arith.constant 1 : index
    %c0_32 = arith.constant 0 : index
    %46 = vector.load %arg6[%c1_31, %c0_32] : memref<3x512xf32, #tpu.memory_space<vmem>>, vector<1x512xf32>
    %47 = vector.broadcast %46 : vector<1x512xf32> to vector<32x512xf32>
    %48 = arith.mulf %45, %47 : vector<32x512xf32>
    %c2_33 = arith.constant 2 : index
    %c0_34 = arith.constant 0 : index
    %49 = vector.load %arg6[%c2_33, %c0_34] : memref<3x512xf32, #tpu.memory_space<vmem>>, vector<1x512xf32>
    %50 = vector.broadcast %49 : vector<1x512xf32> to vector<32x512xf32>
    %51 = arith.addf %48, %50 : vector<32x512xf32>
    %c0_35 = arith.constant 0 : index
    %c0_36 = arith.constant 0 : index
    %52 = vector.load %arg7[%c0_35, %c0_36] : memref<64x32xf32, #tpu.memory_space<vmem>>, vector<64x32xf32>
    %cst_37 = arith.constant dense<0.000000e+00> : vector<64x512xf32>
    %53 = tpu.matmul %52, %51, %cst_37 {dimension_numbers = #tpu.dot_dimension_numbers<[1], [0], [0], [1], [0, 0, 1, 1], [], []>} : vector<64x32xf32>, vector<32x512xf32>, vector<64x512xf32> -> vector<64x512xf32>
    %c0_38 = arith.constant 0 : index
    %c0_39 = arith.constant 0 : index
    %c0_40 = arith.constant 0 : index
    %54 = vector.load %arg8[%c0_38, %c0_39, %c0_40] : memref<1x64x512xf32, #tpu.memory_space<vmem>>, vector<1x64x512xf32>
    %55 = vector.shape_cast %54 : vector<1x64x512xf32> to vector<64x512xf32>
    %56 = vector.shape_cast %53 : vector<64x512xf32> to vector<1x64x512xf32>
    tpu.vector_store %arg8[%c0_38, %c0_39, %c0_40], %56 {strides = array<i32>} : memref<1x64x512xf32, #tpu.memory_space<vmem>>, vector<1x64x512xf32>,
    return
  }
  func.func @transform_0(%arg0: i32) -> (i32, i32, i32) {
    %c0_i32 = arith.constant 0 : i32
    %c0_i32_0 = arith.constant 0 : i32
    %c0_i32_1 = arith.constant 0 : i32
    return %arg0, %c0_i32, %c0_i32_0 : i32, i32, i32
  }
  func.func @transform_1(%arg0: i32) -> (i32, i32) {
    %c0_i32 = arith.constant 0 : i32
    %c0_i32_0 = arith.constant 0 : i32
    %c0_i32_1 = arith.constant 0 : i32
    return %c0_i32, %c0_i32_0 : i32, i32
  }
  func.func @transform_2(%arg0: i32) -> (i32, i32) {
    %c0_i32 = arith.constant 0 : i32
    %c0_i32_0 = arith.constant 0 : i32
    %c0_i32_1 = arith.constant 0 : i32
    return %c0_i32, %c0_i32_0 : i32, i32
  }
  func.func @transform_3(%arg0: i32) -> (i32, i32) {
    %c0_i32 = arith.constant 0 : i32
    %c0_i32_0 = arith.constant 0 : i32
    %c0_i32_1 = arith.constant 0 : i32
    return %c0_i32, %c0_i32_0 : i32, i32
  }
  func.func @transform_4(%arg0: i32) -> (i32, i32) {
    %c0_i32 = arith.constant 0 : i32
    %c0_i32_0 = arith.constant 0 : i32
    %c0_i32_1 = arith.constant 0 : i32
    return %c0_i32, %c0_i32_0 : i32, i32
  }
  func.func @transform_5(%arg0: i32) -> (i32, i32) {
    %c0_i32 = arith.constant 0 : i32
    %c0_i32_0 = arith.constant 0 : i32
    %c0_i32_1 = arith.constant 0 : i32
    return %c0_i32, %c0_i32_0 : i32, i32
  }
  func.func @transform_6(%arg0: i32) -> (i32, i32) {
    %c0_i32 = arith.constant 0 : i32
    %c0_i32_0 = arith.constant 0 : i32
    %c0_i32_1 = arith.constant 0 : i32
    return %c0_i32, %c0_i32_0 : i32, i32
  }
  func.func @transform_7(%arg0: i32) -> (i32, i32, i32) {
    %c0_i32 = arith.constant 0 : i32
    %c0_i32_0 = arith.constant 0 : i32
    %c0_i32_1 = arith.constant 0 : i32
    return %arg0, %c0_i32, %c0_i32_0 : i32, i32, i32
  }
}

</mosaic_0001>

<bundles_post_ra>
// kernel: forward.1
= control target key start
LH: loop header
LB: loop body
LE: loop exit
PB: predicated region body
PF: predicated region fallthrough
CT: control target
= control target key end

     0   :  { %12 = vsyncpa [#allocation5], 0  ;;  %s3754_s24 = smov 0   ;;  %s4259_s0 = inlined_call_operand.vmem [shape: f32[2,16,64], index: 0, kind: input, shape index: {}]   ;;  %s4260_s1 = inlined_call_operand.vmem [shape: bf16[384,256], index: 1, kind: input, shape index: {}]   ;;  %s4261_s2 = inlined_call_operand.vmem [shape: f32[3,256], index: 2, kind: input, shape index: {}]   ;;  %s4262_s3 = inlined_call_operand.vmem [shape: f32[32,16], index: 3, kind: input, shape index: {}]   ;;  %s4263_s4 = inlined_call_operand.hbm [shape: bf16[768,512], index: 4, kind: input, shape index: {}]   ;;  %s4264_s5 = inlined_call_operand.vmem [shape: f32[3,512], index: 5, kind: input, shape index: {}]   ;;  %s4265_s6 = inlined_call_operand.vmem [shape: f32[64,32], index: 6, kind: input, shape index: {}]   ;;  %s4266_s7 = inlined_call_operand.vmem [shape: f32[2,64,512], index: 7, kind: output, shape index: {}]  }
   0x1 LB: > { %s3760_s25 = sadd.s32 4294967295, %s3706_s24   ;;  %p2893_p0 = scmp.ge.s32.totalorder %s3706_s24, 1  ;;  %s3706_s24 = sphi %s3754_s24, %s18_s24  }
   0x2   : > { %p201_p1 = scmp.lt.s32.totalorder %s3706_s24, 3  ;;  %s3708_s26 = smov [#allocation4]  }
   0x3   : > { %s222_s27 = sshll.u32 %s3708_s26, 4  ;;  %p4267_p3 = scmp.eq.s32.totalorder %s3760_s25, 0  ;;  %s223_s27 = int_to_ptr.vmem [resolvable:$true] %s222_s27 }
   0x4   : > { %p3764_p2 = pnand %p2893_p0, %p201_p1  ;;  %s3668_s9 = scalar_lea.hbm %s4263_s4, 24576 }
   0x5   : > { %p3669_p6 = scmp.ne.s32.totalorder %s4263_s4, %s3668_s9  ;;  %p3675_p10 = scmp.lt.u32.totalorder %s3668_s9, %s4263_s4 }
   0x6   : > { %s4269_s28 = scalar_select %p3764_p2, 1, 0 }
   0x7   : > { %p3288_p4 = pneg %p3764_p2 }
   0x9   : > { %p3773_p5 = pnand %p4267_p3, %p3288_p4 }
   0xb   : > { %p3670_p7 = pneg %p3773_p5 }
   0xd   : > { %p3671_p8 = pnand %p3670_p7, %p3669_p6 }
   0xf   : > { %p3672_p9 = pneg %p3671_p8 }
  0x11   : > { %p3677_p11 = pnand %p3675_p10, %p3672_p9 }
  0x13   : > { %3680 = shalt.err (!%p3677_p11)
}
  0x14   : > { %s3681_s14 = scalar_lea.vmem %s223_s27, 24576  ;;  %p3689_p1 = scmp.lt.s32.totalorder %s223_s27, %s223_s27 }
  0x15   : > { %p3682_p12 = scmp.ne.s32.totalorder %s223_s27, %s3681_s14  ;;  %p3690_p4 = scmp.lt.s32.totalorder %s3681_s14, %s3681_s14 }
  0x17   : > { %p3684_p13 = pnand %p3682_p12, %p3670_p7  ;;  %p3691_p3 = por %p3690_p4, %p3689_p1 }
  0x19   : > { %p3685_p0 = pneg %p3684_p13 }
  0x1b   : > { %p3692_p2 = pnand %p3691_p3, %p3685_p0 }
  0x1d   : > { %3695 = shalt.err (!%p3692_p2)
}
  0x1e   : > { %s3709_s15 = smov 256   ;;  %s3710_s16 = smov 16  }
  0x1f   : > { %3291 = dma.hbm_to_vmem [thread:$0]  (!%p3773_p5), %s4263_s4, 24576, %s223_s27, [#allocation5], %s3709_s15, %s3709_s15, %s3710_s16  }
  0x20   : > { %p4271_p6 = scmp.ne.s32.totalorder %s4269_s28, 0 }
  0x21   : > { %p4272_p8 = scmp.eq.s32.totalorder (!%p4271_p6), %s3760_s25, 0 }
  0x22   : > { %252 = sbr.rel (%p4271_p6) target bundleno = 1231 (0x4cf), region = 48 }
  0x29   : > { %3701 = dma.done.wait (%p4272_p8), [#allocation5], 24576   ;;  %p4273_p7 = pmov %p4272_p8 }
  0x2a   : > { %v3308_v0 = vld [vmem:[%s4260_s1 + $0x4] ss:$8 sps:$4 sm:$0xff]   ;;  %v3310_v1 = vld [vmem:[%s4260_s1] ss:$8 sps:$4 sm:$0xff]   ;;  %v3311_v2 = vld [vmem:[%s4260_s1 + $0x14] ss:$8 sps:$4 sm:$0xff]  }
  0x2b   : > { %3703 = vsyncadd (%p4273_p7), [#allocation5], 4294942720  ;;  %625 = vmatprep.subr.bf16.mxu0 %v3308_v0  ;;  %v3313_v3 = vld [vmem:[%s4260_s1 + $0x10] ss:$8 sps:$4 sm:$0xff]   ;;  %v3314_v4 = vld [vmem:[%s4260_s1 + $0x24] ss:$8 sps:$4 sm:$0xff]  }
  0x2c   : > { %626 = vmatpush1.bf16.msra.mxu0 %v3310_v1  ;;  %v3316_v5 = vld [vmem:[%s4260_s1 + $0x20] ss:$8 sps:$4 sm:$0xff]   ;;  %p284_p2 = scmp.lt.s32.totalorder %s3760_s25, 1  ;;  %v3317_v6 = vld [vmem:[%s4260_s1 + $0x34] ss:$8 sps:$4 sm:$0xff]   ;;  %vm297_vm0 = vcmask 523264  }
  0x2d   : > { %627 = vmatprep.subr.bf16.mxu0 %v3311_v2  ;;  %v3319_v7 = vld [vmem:[%s4260_s1 + $0x30] ss:$8 sps:$4 sm:$0xff]   ;;  %v3320_v8 = vld [vmem:[%s4260_s1 + $0x44] ss:$8 sps:$4 sm:$0xff]   ;;  %v3322_v9 = vld [vmem:[%s4260_s1 + $0x40] ss:$8 sps:$4 sm:$0xff]  }
  0x2e   : > { %s4281_s25 = smov (!%p284_p2, %s3760_s25), 1  ;;  %v3323_v10 = vld [vmem:[%s4260_s1 + $0x54] ss:$8 sps:$4 sm:$0xff]   ;;  %v3325_v11 = vld [vmem:[%s4260_s1 + $0x50] ss:$8 sps:$4 sm:$0xff]   ;;  %vm3170_vm1 = vmpackc.low %vm297_vm0, %vm297_vm0  ;;  %vm302_vm2 = vcmask 1040384  }
  0x2f   : > { %s3168_s18 = sshll.u32 %s4281_s25, 4  ;;  %v3326_v12 = vld [vmem:[%s4260_s1 + $0x64] ss:$8 sps:$4 sm:$0xff]   ;;  %v3328_v16 = vld [vmem:[%s4260_s1 + $0x60] ss:$8 sps:$4 sm:$0xff]   ;;  %vm3885_vm3 = vmneg %vm302_vm2  ;;  %vm3711_vm4 = vmmov 1  }
  0x30   : > { %628 = vmatpush1.bf16.msra.mxu0 %v3313_v3  ;;  %s288_s23 = scalar_lea.vmem %s4259_s0, %s3168_s18  ;;  %v3329_v17 = vld [vmem:[%s4260_s1 + $0x74] ss:$8 sps:$4 sm:$0xff]   ;;  %v3331_v18 = vld [vmem:[%s4260_s1 + $0x70] ss:$8 sps:$4 sm:$0xff]   ;;  %v3332_v19 = vld [vmem:[%s4260_s1 + $0x84] ss:$8 sps:$4 sm:$0xff]  }
  0x31   : > { %629 = vmatprep.subr.bf16.mxu0 %v3314_v4  ;;  %v295_v13 = vld [vmem:[%s288_s23] sm:$0xff]  ;;  %v296_v14 = vld [vmem:[%s288_s23 + $0x8] sm:$0xff]  ;;  %v3335_v21 = vld [vmem:[%s4260_s1 + $0x94] ss:$8 sps:$4 sm:$0xff]   ;;  %v3712_v48 = vmov 0   ;;  %vm309_vm6 = vcmask 1046528  }
  0x32   : > { %v3171_v15 = vpack.c.bf16 %v296_v14, %v295_v13  ;;  %v3334_v20 = vld [vmem:[%s4260_s1 + $0x80] ss:$8 sps:$4 sm:$0xff]   ;;  %v3337_v22 = vld [vmem:[%s4260_s1 + $0x90] ss:$8 sps:$4 sm:$0xff]   ;;  %v3338_v23 = vld [vmem:[%s4260_s1 + $0xa4] ss:$8 sps:$4 sm:$0xff]  }
  0x33   : > { %v3340_v24 = vld [vmem:[%s4260_s1 + $0xa0] ss:$8 sps:$4 sm:$0xff]   ;;  %v3341_v25 = vld [vmem:[%s4260_s1 + $0xb4] ss:$8 sps:$4 sm:$0xff]   ;;  %v3343_v26 = vld [vmem:[%s4260_s1 + $0xb0] ss:$8 sps:$4 sm:$0xff]  }
  0x34   : > { %630 = vmatpush1.bf16.msra.mxu0 %v3316_v5  ;;  %3172 = vmatprep.mubr.msk.bf16.mxu0 %vm3170_vm1, %v3171_v15  ;;  %v3344_v27 = vld [vmem:[%s4260_s1 + $0xc4] ss:$8 sps:$4 sm:$0xff]   ;;  %v3346_v29 = vld [vmem:[%s4260_s1 + $0xc0] ss:$8 sps:$4 sm:$0xff]   ;;  %v3347_v30 = vld [vmem:[%s4260_s1 + $0xd4] ss:$8 sps:$4 sm:$0xff]  }
  0x35   : > { %631 = vmatprep.subr.bf16.mxu0 %v3317_v6  ;;  %v3349_v31 = vld [vmem:[%s4260_s1 + $0xd0] ss:$8 sps:$4 sm:$0xff]   ;;  %v3350_v32 = vld [vmem:[%s4260_s1 + $0xe4] ss:$8 sps:$4 sm:$0xff]   ;;  %v298_v33 = vsel %vm297_vm0, %v295_v13, 0.0  ;;  %v299_v34 = vsel %vm297_vm0, %v296_v14, 0.0  ;;  %vm3912_vm5 = vmpackc.low %vm3711_vm4, %vm3885_vm3 }
  0x36   : > { %v3352_v35 = vld [vmem:[%s4260_s1 + $0xe0] ss:$8 sps:$4 sm:$0xff]   ;;  %v3353_v36 = vld [vmem:[%s4260_s1 + $0xf4] ss:$8 sps:$4 sm:$0xff]   ;;  %v303_v37 = vrot.slane %v298_v33, 7  ;;  %v304_v38 = vrot.slane %v299_v34, 7  ;;  %vm3969_vm7 = vmpackc.low %vm309_vm6, %vm3711_vm4 }
  0x37   : > { %v3355_v40 = vld [vmem:[%s4260_s1 + $0xf0] ss:$8 sps:$4 sm:$0xff]   ;;  %v3358_v41 = vld [vmem:[%s4260_s1 + $0x104] ss:$8 sps:$4 sm:$0xff]   ;;  %v3356_v43 = vld [vmem:[%s4260_s1 + $0x100] ss:$8 sps:$4 sm:$0xff]  }
  0x38   : > { %632 = vmatpush1.bf16.msra.mxu0 %v3319_v7  ;;  %v305_v42 = vsel %vm302_vm2, %v303_v37, %v304_v38  ;;  %v3361_v45 = vld [vmem:[%s4260_s1 + $0x114] ss:$8 sps:$4 sm:$0xff]   ;;  %v3359_v46 = vld [vmem:[%s4260_s1 + $0x110] ss:$8 sps:$4 sm:$0xff]   ;;  %v3364_v47 = vld [vmem:[%s4260_s1 + $0x124] ss:$8 sps:$4 sm:$0xff]  }
  0x39   : > { %633 = vmatprep.subr.bf16.mxu0 %v3320_v8  ;;  %v3175_v44 = vpack.c.bf16 %v305_v42, %v303_v37  ;;  %v3362_v49 = vld [vmem:[%s4260_s1 + $0x120] ss:$8 sps:$4 sm:$0xff]   ;;  %v3367_v50 = vld [vmem:[%s4260_s1 + $0x134] ss:$8 sps:$4 sm:$0xff]   ;;  %v3365_v51 = vld [vmem:[%s4260_s1 + $0x130] ss:$8 sps:$4 sm:$0xff]  }
  0x3a   : > { %v3370_v52 = vld [vmem:[%s4260_s1 + $0x144] ss:$8 sps:$4 sm:$0xff]   ;;  %v3368_v53 = vld [vmem:[%s4260_s1 + $0x140] ss:$8 sps:$4 sm:$0xff]   ;;  %v3373_v54 = vld [vmem:[%s4260_s1 + $0x154] ss:$8 sps:$4 sm:$0xff]  }
  0x3b   : > { %v3371_v55 = vld [vmem:[%s4260_s1 + $0x150] ss:$8 sps:$4 sm:$0xff]   ;;  %v3376_v56 = vld [vmem:[%s4260_s1 + $0x164] ss:$8 sps:$4 sm:$0xff]   ;;  %v3374_v57 = vld [vmem:[%s4260_s1 + $0x160] ss:$8 sps:$4 sm:$0xff]  }
  0x3c   : > { %634 = vmatpush1.bf16.msra.mxu0 %v3322_v9  ;;  %v3379_v58 = vld [vmem:[%s4260_s1 + $0x174] ss:$8 sps:$4 sm:$0xff]   ;;  %v310_v59 = vrot.slane %v298_v33, 1  ;;  %v311_v60 = vrot.slane %v299_v34, 1  ;;  %v3377_v62 = vld [vmem:[%s4260_s1 + $0x170] ss:$8 sps:$4 sm:$0xff]  }
  0x3d   : > { %635 = vmatprep.subr.bf16.mxu0 %v3323_v10  ;;  %v3713_v1 = vmov 0.0   ;;  %v3383_v2 = vld [vmem:[#allocation4 + $0x8] ss:$16 sps:$4 sm:$0xff]   ;;  %v3385_v3 = vld [vmem:[#allocation4 + $0xc] ss:$16 sps:$4 sm:$0xff]   ;;  %vm753_vm8 = vcmask 130048  }
  0x3e   : > { %v312_v63 = vsel %vm309_vm6, %v310_v59, %v311_v60  ;;  %830 = vmatprep.mubr.f32.mxu1 %v3713_v1  ;;  %v3391_v4 = vld [vmem:[#allocation4 + $0x2c] ss:$16 sps:$4 sm:$0xff]   ;;  %v3389_v5 = vld [vmem:[#allocation4 + $0x28] ss:$16 sps:$4 sm:$0xff]   ;;  %v3490_v39 = vld [vmem:[#allocation4 + $0x244] ss:$16 sps:$4 sm:$0xff]  }
  0x3f   : > { %v3178_v0 = vpack.c.bf16 %v311_v60, %v312_v63  ;;  %v3397_v6 = vld [vmem:[#allocation4 + $0x4c] ss:$16 sps:$4 sm:$0xff]   ;;  %v3395_v7 = vld [vmem:[#allocation4 + $0x48] ss:$16 sps:$4 sm:$0xff]   ;;  %vm2541_vm9 = vcmask 261120   ;;  %s3169_s8 = sshll.u32 %s4281_s25, 8 }
  0x40   : > { %636 = vmatpush1.bf16.msra.mxu0 %v3325_v11  ;;  %v3403_v8 = vld [vmem:[#allocation4 + $0x6c] ss:$16 sps:$4 sm:$0xff]   ;;  %v3401_v9 = vld [vmem:[#allocation4 + $0x68] ss:$16 sps:$4 sm:$0xff]   ;;  %s4222_s11 = scalar_lea.vmem %s4266_s7, %s3169_s8 }
  0x41   : > { %637 = vmatprep.subr.bf16.mxu0 %v3326_v12  ;;  %v3409_v10 = vld [vmem:[#allocation4 + $0x8c] ss:$16 sps:$4 sm:$0xff]   ;;  %v3407_v11 = vld [vmem:[#allocation4 + $0x88] ss:$16 sps:$4 sm:$0xff]  }
  0x42   : > { %v3415_v12 = vld [vmem:[#allocation4 + $0xac] ss:$16 sps:$4 sm:$0xff]   ;;  %v3413_v13 = vld [vmem:[#allocation4 + $0xa8] ss:$16 sps:$4 sm:$0xff]  }
  0x43   : > { %v3421_v14 = vld [vmem:[#allocation4 + $0xcc] ss:$16 sps:$4 sm:$0xff]   ;;  %v3419_v15 = vld [vmem:[#allocation4 + $0xc8] ss:$16 sps:$4 sm:$0xff]  }
  0x44   : > { %638 = vmatpush1.bf16.msra.mxu0 %v3328_v16  ;;  %v3427_v16 = vld [vmem:[#allocation4 + $0xec] ss:$16 sps:$4 sm:$0xff]   ;;  %v373_v33 = vld [vmem:[%s4261_s2] ss:$4 sm:$0x3] }
  0x45   : > { %639 = vmatprep.subr.bf16.mxu0 %v3329_v17  ;;  %v3425_v17 = vld [vmem:[#allocation4 + $0xe8] ss:$16 sps:$4 sm:$0xff]   ;;  %v3463_v28 = vld [vmem:[#allocation4 + $0x1ac] ss:$16 sps:$4 sm:$0xff]  }
  0x48   : > { %640 = vmatpush1.bf16.msra.mxu0 %v3331_v18  ;;  %v3433_v18 = vld [vmem:[#allocation4 + $0x10c] ss:$16 sps:$4 sm:$0xff]  }
  0x49   : > { %641 = vmatprep.subr.bf16.mxu0 %v3332_v19  ;;  %v3431_v19 = vld [vmem:[#allocation4 + $0x108] ss:$16 sps:$4 sm:$0xff]  }
  0x4c   : > { %642 = vmatpush1.bf16.msra.mxu0 %v3334_v20  ;;  %v3439_v20 = vld [vmem:[#allocation4 + $0x12c] ss:$16 sps:$4 sm:$0xff]  }
  0x4d   : > { %643 = vmatprep.subr.bf16.mxu0 %v3335_v21  ;;  %v3437_v21 = vld [vmem:[#allocation4 + $0x128] ss:$16 sps:$4 sm:$0xff]  }
  0x50   : > { %644 = vmatpush1.bf16.msra.mxu0 %v3337_v22  ;;  %v3445_v22 = vld [vmem:[#allocation4 + $0x14c] ss:$16 sps:$4 sm:$0xff]  }
  0x51   : > { %645 = vmatprep.subr.bf16.mxu0 %v3338_v23  ;;  %v3443_v23 = vld [vmem:[#allocation4 + $0x148] ss:$16 sps:$4 sm:$0xff]  }
  0x54   : > { %646 = vmatpush1.bf16.msra.mxu0 %v3340_v24  ;;  %v3451_v24 = vld [vmem:[#allocation4 + $0x16c] ss:$16 sps:$4 sm:$0xff]  }
  0x55   : > { %647 = vmatprep.subr.bf16.mxu0 %v3341_v25  ;;  %v3449_v25 = vld [vmem:[#allocation4 + $0x168] ss:$16 sps:$4 sm:$0xff]  }
  0x58   : > { %648 = vmatpush1.bf16.msra.mxu0 %v3343_v26  ;;  %v3457_v26 = vld [vmem:[#allocation4 + $0x18c] ss:$16 sps:$4 sm:$0xff]  }
  0x59   : > { %649 = vmatprep.subr.bf16.mxu0 %v3344_v27  ;;  %v3455_v27 = vld [vmem:[#allocation4 + $0x188] ss:$16 sps:$4 sm:$0xff]  }
  0x5c   : > { %650 = vmatpush1.bf16.msra.mxu0 %v3346_v29  ;;  %v3461_v29 = vld [vmem:[#allocation4 + $0x1a8] ss:$16 sps:$4 sm:$0xff]  }
  0x5d   : > { %651 = vmatprep.subr.bf16.mxu0 %v3347_v30  ;;  %v375_v30 = vlaneseq }
  0x60   : > { %652 = vmatpush1.bf16.msra.mxu0 %v3349_v31  ;;  %v3980_v31 = vshrl.u32 %v375_v30, 7  ;;  %v3448_v30 = vld [vmem:[#allocation4 + $0x164] ss:$16 sps:$4 sm:$0xff]  }
  0x61   : > { %653 = vmatprep.subr.bf16.mxu0 %v3350_v32 }
  0x62   : > { %v3983_v32 = vsub.s32 0, %v3980_v31  ;;  %v3989_v34 = vsub.s32 1, %v3980_v31 }
  0x64   : > { %654 = vmatpush1.bf16.msra.mxu0 %v3352_v35  ;;  %v378_v35 = vrot.slane %v373_v33, %v3983_v32  ;;  %v382_v37 = vrot.slane %v373_v33, %v3989_v34  ;;  %v3446_v33 = vld [vmem:[#allocation4 + $0x160] ss:$16 sps:$4 sm:$0xff]  }
  0x65   : > { %655 = vmatprep.subr.bf16.mxu0 %v3353_v36  ;;  %v2950_v36 = vld [vmem:[%s4261_s2 + $0x1] ss:$4 sm:$0x3] }
  0x68   : > { %656 = vmatpush1.bf16.msra.mxu0 %v3355_v40 }
  0x69   : > { %668 = vmatprep.subr.bf16.mxu0 %v3358_v41  ;;  %v721_v41 = vrot.slane %v2950_v36, %v3983_v32 }
  0x6b   : > { %3176 = vmatmul.mubr.msk.bf16.vlgmr.msra.gmra.mrb[0].mxu0 %vm3912_vm5, %v3175_v44  ;;  %v725_v44 = vrot.slane %v2950_v36, %v3989_v34  ;;  %v3452_v36 = vld [vmem:[#allocation4 + $0x180] ss:$16 sps:$4 sm:$0xff]  }
  0x6c   : > { %669 = vmatpush1.bf16.msra.mxu0 %v3356_v43  ;;  %700 = vmatprep.mubr.bf16.mxu0 %v3712_v48 }
  0x6d   : > { %670 = vmatprep.subr.bf16.mxu0 %v3361_v45 }
  0x70   : > { %671 = vmatpush1.bf16.msra.mxu0 %v3359_v46  ;;  %v2951_v46 = vld [vmem:[%s4261_s2 + $0x2] ss:$4 sm:$0x3] }
  0x71   : > { %672 = vmatprep.subr.bf16.mxu0 %v3364_v47 }
  0x74   : > { %673 = vmatpush1.bf16.msra.mxu0 %v3362_v49 }
  0x75   : > { %674 = vmatprep.subr.bf16.mxu0 %v3367_v50 }
  0x78   : > { %675 = vmatpush1.bf16.msra.mxu0 %v3365_v51 }
  0x79   : > { %676 = vmatprep.subr.bf16.mxu0 %v3370_v52 }
  0x7c   : > { %677 = vmatpush1.bf16.msra.mxu0 %v3368_v53 }
  0x7d   : > { %678 = vmatprep.subr.bf16.mxu0 %v3373_v54  ;;  %v738_v54 = vrot.slane %v2951_v46, %v3983_v32 }
  0x80   : > { %679 = vmatpush1.bf16.msra.mxu0 %v3371_v55 }
  0x81   : > { %680 = vmatprep.subr.bf16.mxu0 %v3376_v56 }
  0x84   : > { %681 = vmatpush1.bf16.msra.mxu0 %v3374_v57  ;;  %v742_v57 = vrot.slane %v2951_v46, %v3989_v34  ;;  %v3470_v46 = vld [vmem:[#allocation4 + $0x1e0] ss:$16 sps:$4 sm:$0xff]  }
  0x85   : > { %682 = vmatprep.subr.bf16.mxu0 %v3379_v58 }
  0x88   : > { %683 = vmatpush1.bf16.msra.mxu0 %v3377_v62 }
  0x89   : > { %2280 = vmatprep.subr.bf16.mxu0 %v3385_v3 }
  0x8b   : > { %3179 = vmatmul.mubr.msk.bf16.vlgmr.msra.gmra.mrb[0].mxu0 %vm3969_vm7, %v3178_v0 }
  0x8c   : > { %2281 = vmatpush1.bf16.msra.mxu0 %v3383_v2 }
  0x8d   : > { %2282 = vmatprep.subr.bf16.mxu0 %v3391_v4  ;;  %v3382_v4 = vld [vmem:[#allocation4 + $0x4] ss:$16 sps:$4 sm:$0xff]  }
  0x90   : > { %2283 = vmatpush1.bf16.msra.mxu0 %v3389_v5  ;;  %v749_v5 = vld [vmem:[%s4262_s3] sm:$0xff] }
  0x91   : > { %2284 = vmatprep.subr.bf16.mxu0 %v3397_v6  ;;  %v3380_v6 = vld [vmem:[#allocation4] ss:$16 sps:$4 sm:$0xff]  }
  0x94   : > { %2285 = vmatpush1.bf16.msra.mxu0 %v3395_v7  ;;  %v3388_v7 = vld [vmem:[#allocation4 + $0x24] ss:$16 sps:$4 sm:$0xff]  }
  0x95   : > { %2286 = vmatprep.subr.bf16.mxu0 %v3403_v8  ;;  %v750_v8 = vld [vmem:[%s4262_s3 + $0x8] sm:$0xff] }
  0x98   : > { %2287 = vmatpush1.bf16.msra.mxu0 %v3401_v9  ;;  %v3386_v9 = vld [vmem:[#allocation4 + $0x20] ss:$16 sps:$4 sm:$0xff]  }
  0x99   : > { %2288 = vmatprep.subr.bf16.mxu0 %v3409_v10  ;;  %v3394_v10 = vld [vmem:[#allocation4 + $0x44] ss:$16 sps:$4 sm:$0xff]  }
  0x9c   : > { %2289 = vmatpush1.bf16.msra.mxu0 %v3407_v11  ;;  %v751_v11 = vld [vmem:[%s4262_s3 + $0x10] sm:$0xff] }
  0x9d   : > { %2290 = vmatprep.subr.bf16.mxu0 %v3415_v12  ;;  %v3392_v12 = vld [vmem:[#allocation4 + $0x40] ss:$16 sps:$4 sm:$0xff]  }
  0xa0   : > { %2291 = vmatpush1.bf16.msra.mxu0 %v3413_v13  ;;  %v3400_v13 = vld [vmem:[#allocation4 + $0x64] ss:$16 sps:$4 sm:$0xff]  }
  0xa1   : > { %2292 = vmatprep.subr.bf16.mxu0 %v3421_v14  ;;  %v752_v14 = vld [vmem:[%s4262_s3 + $0x18] sm:$0xff] }
  0xa4   : > { %2293 = vmatpush1.bf16.msra.mxu0 %v3419_v15  ;;  %v3398_v15 = vld [vmem:[#allocation4 + $0x60] ss:$16 sps:$4 sm:$0xff]  }
  0xa5   : > { %2294 = vmatprep.subr.bf16.mxu0 %v3427_v16  ;;  %v3406_v16 = vld [vmem:[#allocation4 + $0x84] ss:$16 sps:$4 sm:$0xff]  }
  0xa8   : > { %2295 = vmatpush1.bf16.msra.mxu0 %v3425_v17  ;;  %v3404_v17 = vld [vmem:[#allocation4 + $0x80] ss:$16 sps:$4 sm:$0xff]  }
  0xa9   : > { %2296 = vmatprep.subr.bf16.mxu0 %v3433_v18  ;;  %v3412_v18 = vld [vmem:[#allocation4 + $0xa4] ss:$16 sps:$4 sm:$0xff]  }
  0xac   : > { %2297 = vmatpush1.bf16.msra.mxu0 %v3431_v19  ;;  %v3410_v19 = vld [vmem:[#allocation4 + $0xa0] ss:$16 sps:$4 sm:$0xff]  }
  0xad   : > { %2298 = vmatprep.subr.bf16.mxu0 %v3439_v20  ;;  %v3418_v20 = vld [vmem:[#allocation4 + $0xc4] ss:$16 sps:$4 sm:$0xff]  }
  0xb0   : > { %2299 = vmatpush1.bf16.msra.mxu0 %v3437_v21  ;;  %v3416_v21 = vld [vmem:[#allocation4 + $0xc0] ss:$16 sps:$4 sm:$0xff]  }
  0xb1   : > { %2300 = vmatprep.subr.bf16.mxu0 %v3445_v22  ;;  %v3424_v22 = vld [vmem:[#allocation4 + $0xe4] ss:$16 sps:$4 sm:$0xff]  }
  0xb4   : > { %2301 = vmatpush1.bf16.msra.mxu0 %v3443_v23  ;;  %v3422_v23 = vld [vmem:[#allocation4 + $0xe0] ss:$16 sps:$4 sm:$0xff]  }
  0xb5   : > { %2302 = vmatprep.subr.bf16.mxu0 %v3451_v24  ;;  %v3430_v24 = vld [vmem:[#allocation4 + $0x104] ss:$16 sps:$4 sm:$0xff]  }
  0xb8   : > { %2303 = vmatpush1.bf16.msra.mxu0 %v3449_v25  ;;  %v3428_v25 = vld [vmem:[#allocation4 + $0x100] ss:$16 sps:$4 sm:$0xff]  }
  0xb9   : > { %2304 = vmatprep.subr.bf16.mxu0 %v3457_v26  ;;  %v3436_v26 = vld [vmem:[#allocation4 + $0x124] ss:$16 sps:$4 sm:$0xff]  }
  0xbc   : > { %2305 = vmatpush1.bf16.msra.mxu0 %v3455_v27  ;;  %v3434_v27 = vld [vmem:[#allocation4 + $0x120] ss:$16 sps:$4 sm:$0xff]  }
  0xbd   : > { %2306 = vmatprep.subr.bf16.mxu0 %v3463_v28  ;;  %v3442_v28 = vld [vmem:[#allocation4 + $0x144] ss:$16 sps:$4 sm:$0xff]  }
  0xc0   : > { %2307 = vmatpush1.bf16.msra.mxu0 %v3461_v29  ;;  %v3440_v29 = vld [vmem:[#allocation4 + $0x140] ss:$16 sps:$4 sm:$0xff]  }
 0x15e   : > { %v702_v38 = vpop.f32.mrb[0].mxu0 }
 0x15f   : > { %v3228_v40 = vadd.f32 %v702_v38, %v378_v35  ;;  %v704_v42 = vpop.f32.mrb[1].mxu0  ;;  %v3458_v38 = vld [vmem:[#allocation4 + $0x1a0] ss:$16 sps:$4 sm:$0xff]  }
 0x160   : > { %v3229_v43 = vadd.f32 %v704_v42, %v382_v37  ;;  %v706_v45 = vpop.f32.mrb[2].mxu0  ;;  %v3464_v42 = vld [vmem:[#allocation4 + $0x1c0] ss:$16 sps:$4 sm:$0xff]  }
 0x161   : > { %v711_v47 = vmax.f32 %v3228_v40, 0.0  ;;  %v3230_v48 = vadd.f32 %v706_v45, %v378_v35  ;;  %v708_v49 = vpop.f32.mrb[3].mxu0  ;;  %v3454_v35 = vld [vmem:[#allocation4 + $0x184] ss:$16 sps:$4 sm:$0xff]   ;;  %v3475_v45 = vld [vmem:[#allocation4 + $0x1ec] ss:$16 sps:$4 sm:$0xff]  }
 0x162   : > { %v712_v50 = vmax.f32 %v3229_v43, 0.0  ;;  %v3231_v51 = vadd.f32 %v708_v49, %v382_v37  ;;  %v3460_v37 = vld [vmem:[#allocation4 + $0x1a4] ss:$16 sps:$4 sm:$0xff]   ;;  %v3467_v43 = vld [vmem:[#allocation4 + $0x1c8] ss:$16 sps:$4 sm:$0xff]  }
 0x163   : > { %v728_v52 = vmul.f32 %v721_v41, %v711_v47  ;;  %v713_v53 = vmax.f32 %v3230_v48, 0.0  ;;  %v3466_v40 = vld [vmem:[#allocation4 + $0x1c4] ss:$16 sps:$4 sm:$0xff]   ;;  %v3473_v47 = vld [vmem:[#allocation4 + $0x1e8] ss:$16 sps:$4 sm:$0xff]  }
 0x164   : > { %v729_v55 = vmul.f32 %v725_v44, %v712_v50  ;;  %v714_v56 = vmax.f32 %v3231_v51, 0.0  ;;  %v3478_v48 = vld [vmem:[#allocation4 + $0x204] ss:$16 sps:$4 sm:$0xff]   ;;  %v3481_v49 = vld [vmem:[#allocation4 + $0x20c] ss:$16 sps:$4 sm:$0xff]  }
 0x165   : > { %v730_v58 = vmul.f32 %v721_v41, %v713_v53  ;;  %v745_v60 = vadd.f32 %v738_v54, %v728_v52  ;;  %v3469_v41 = vld [vmem:[#allocation4 + $0x1cc] ss:$16 sps:$4 sm:$0xff]  }
 0x166   : > { %v731_v59 = vmul.f32 %v725_v44, %v714_v56  ;;  %v746_v63 = vadd.f32 %v742_v57, %v729_v55  ;;  %2308 = vmatprep.subr.bf16.mxu0 %v3469_v41  ;;  %v3472_v44 = vld [vmem:[#allocation4 + $0x1e4] ss:$16 sps:$4 sm:$0xff]  }
 0x167   : > { %v747_v62 = vadd.f32 %v738_v54, %v730_v58  ;;  %2309 = vmatpush1.bf16.msra.mxu0 %v3467_v43 }
 0x168   : > { %v748_v0 = vadd.f32 %v742_v57, %v731_v59  ;;  %2310 = vmatprep.subr.bf16.mxu0 %v3475_v45 }
 0x169   : > { %v3210_v2 = vpack.c.bf16 %v747_v62, %v745_v60 }
 0x16a   : > { %v3208_v3 = vpack.c.bf16 %v748_v0, %v746_v63 }
 0x16b   : > { %2311 = vmatpush1.bf16.msra.mxu0 %v3473_v47  ;;  %v3488_v47 = vld [vmem:[#allocation4 + $0x240] ss:$16 sps:$4 sm:$0xff]  }
 0x16c   : > { %3209 = vmatprep.subr.bf16.mxu1 %v3208_v3  ;;  %2333 = vmatprep.subr.bf16.mxu0 %v3481_v49  ;;  %v3496_v49 = vld [vmem:[#allocation4 + $0x264] ss:$16 sps:$4 sm:$0xff]  }
 0x16d   : > { %3211 = vmatpush1.bf16.msra.mxu1 %v3210_v2 }
 0x16e   : > { %2121 = vmatprep.subr.bf16.mxu1 %v3382_v4 }
 0x170   : > { %2952 = vmatmul.mubr.msk.f32.vlgmr.msra.gmra.mrb[0].mxu1 %vm753_vm8, %v749_v5 }
 0x171   : > { %836 = vmatprep.mubr.f32.mxu1 %v3713_v1  ;;  %2122 = vmatpush1.bf16.msra.mxu1 %v3380_v6 }
 0x172   : > { %2123 = vmatprep.subr.bf16.mxu1 %v3388_v7  ;;  %v3476_v7 = vld [vmem:[#allocation4 + $0x200] ss:$16 sps:$4 sm:$0xff]  }
 0x174   : > { %2953 = vmatmul.mubr.msk.f32.gmra.mrb[2].mxu1 %vm753_vm8, %v750_v8 }
 0x175   : > { %842 = vmatprep.mubr.f32.mxu1 %v3713_v1  ;;  %2124 = vmatpush1.bf16.msra.mxu1 %v3386_v9 }
 0x176   : > { %2125 = vmatprep.subr.bf16.mxu1 %v3394_v10 }
 0x178   : > { %2954 = vmatmul.mubr.msk.f32.gmra.mrb[4].mxu1 %vm753_vm8, %v751_v11 }
 0x179   : > { %848 = vmatprep.mubr.f32.mxu1 %v3713_v1  ;;  %2126 = vmatpush1.bf16.msra.mxu1 %v3392_v12 }
 0x17a   : > { %2127 = vmatprep.subr.bf16.mxu1 %v3400_v13  ;;  %v3479_v13 = vld [vmem:[#allocation4 + $0x208] ss:$16 sps:$4 sm:$0xff]  }
 0x17c   : > { %2955 = vmatmul.mubr.msk.f32.gmra.mrb[6].mxu1 %vm753_vm8, %v752_v14 }
 0x17d   : > { %2128 = vmatpush1.bf16.msra.mxu1 %v3398_v15 }
 0x17e   : > { %2129 = vmatprep.subr.bf16.mxu1 %v3406_v16  ;;  %v3484_v16 = vld [vmem:[#allocation4 + $0x224] ss:$16 sps:$4 sm:$0xff]  }
 0x181   : > { %2130 = vmatpush1.bf16.msra.mxu1 %v3404_v17  ;;  %v3487_v17 = vld [vmem:[#allocation4 + $0x22c] ss:$16 sps:$4 sm:$0xff]  }
 0x182   : > { %2131 = vmatprep.subr.bf16.mxu1 %v3412_v18 }
 0x185   : > { %2132 = vmatpush1.bf16.msra.mxu1 %v3410_v19 }
 0x186   : > { %2133 = vmatprep.subr.bf16.mxu1 %v3418_v20 }
 0x189   : > { %2134 = vmatpush1.bf16.msra.mxu1 %v3416_v21 }
 0x18a   : > { %2135 = vmatprep.subr.bf16.mxu1 %v3424_v22  ;;  %v3482_v22 = vld [vmem:[#allocation4 + $0x220] ss:$16 sps:$4 sm:$0xff]  }
 0x18d   : > { %2136 = vmatpush1.bf16.msra.mxu1 %v3422_v23 }
 0x18e   : > { %2137 = vmatprep.subr.bf16.mxu1 %v3430_v24 }
 0x191   : > { %2138 = vmatpush1.bf16.msra.mxu1 %v3428_v25 }
 0x192   : > { %2139 = vmatprep.subr.bf16.mxu1 %v3436_v26 }
 0x195   : > { %2140 = vmatpush1.bf16.msra.mxu1 %v3434_v27 }
 0x196   : > { %2141 = vmatprep.subr.bf16.mxu1 %v3442_v28 }
 0x199   : > { %2142 = vmatpush1.bf16.msra.mxu1 %v3440_v29  ;;  %v3485_v29 = vld [vmem:[#allocation4 + $0x228] ss:$16 sps:$4 sm:$0xff]  }
 0x19a   : > { %2143 = vmatprep.subr.bf16.mxu1 %v3448_v30 }
 0x19d   : > { %2144 = vmatpush1.bf16.msra.mxu1 %v3446_v33 }
 0x19e   : > { %2145 = vmatprep.subr.bf16.mxu1 %v3454_v35 }
 0x1a1   : > { %2146 = vmatpush1.bf16.msra.mxu1 %v3452_v36 }
 0x1a2   : > { %2147 = vmatprep.subr.bf16.mxu1 %v3460_v37  ;;  %v3493_v37 = vld [vmem:[#allocation4 + $0x24c] ss:$16 sps:$4 sm:$0xff]  }
 0x1a5   : > { %2148 = vmatpush1.bf16.msra.mxu1 %v3458_v38 }
 0x1a6   : > { %2149 = vmatprep.subr.bf16.mxu1 %v3466_v40 }
 0x1a9   : > { %2150 = vmatpush1.bf16.msra.mxu1 %v3464_v42 }
 0x1aa   : > { %2151 = vmatprep.subr.bf16.mxu1 %v3472_v44 }
 0x1ad   : > { %2152 = vmatpush1.bf16.msra.mxu1 %v3470_v46 }
 0x1ae   : > { %2174 = vmatprep.subr.bf16.mxu1 %v3478_v48  ;;  %v3491_v48 = vld [vmem:[#allocation4 + $0x248] ss:$16 sps:$4 sm:$0xff]  }
 0x243   : > { %v832_v50 = vpop.f32.mrb[0].mxu1 }
 0x244   : > { %v834_v51 = vpop.f32.mrb[1].mxu1  ;;  %v863_v52 = vrot.slane %v832_v50, 7  ;;  %v887_v53 = vrot.slane %v832_v50, 1 }
 0x245   : > { %v864_v55 = vrot.slane %v834_v51, 7  ;;  %v890_v60 = vrot.slane %v834_v51, 1 }
 0x247   : > { %v838_v54 = vpop.f32.mrb[2].mxu1 }
 0x248   : > { %v865_v56 = vrot.slane %v838_v54, 7  ;;  %v888_v57 = vrot.slane %v838_v54, 1  ;;  %v4022_v58 = vpack.c.bf16 %v838_v54, %v832_v50  ;;  %v840_v59 = vpop.f32.mrb[3].mxu1  ;;  %v3499_v50 = vld [vmem:[#allocation4 + $0x26c] ss:$16 sps:$4 sm:$0xff]  }
 0x249   : > { %v867_v62 = vrot.slane %v840_v59, 7  ;;  %v891_v63 = vrot.slane %v840_v59, 1  ;;  %v4024_v0 = vpack.c.bf16 %v840_v59, %v834_v51  ;;  %v3494_v51 = vld [vmem:[#allocation4 + $0x260] ss:$16 sps:$4 sm:$0xff]   ;;  %v3505_v54 = vld [vmem:[#allocation4 + $0x28c] ss:$16 sps:$4 sm:$0xff]  }
 0x24a   : > { %v866_v2 = vsel %vm302_vm2, %v863_v52, %v865_v56  ;;  %v889_v3 = vsel %vm309_vm6, %v887_v53, %v888_v57  ;;  %v3502_v53 = vld [vmem:[#allocation4 + $0x284] ss:$16 sps:$4 sm:$0xff]   ;;  %v3511_v59 = vld [vmem:[#allocation4 + $0x2ac] ss:$16 sps:$4 sm:$0xff]  }
 0x24b   : > { %v3186_v4 = vpack.c.bf16 %v866_v2, %v863_v52  ;;  %v868_v5 = vsel %vm302_vm2, %v864_v55, %v867_v62  ;;  %v844_v6 = vpop.f32.mrb[4].mxu1  ;;  %v892_v8 = vsel %vm309_vm6, %v890_v60, %v891_v63  ;;  %v3497_v52 = vld [vmem:[#allocation4 + $0x268] ss:$16 sps:$4 sm:$0xff]   ;;  %v3506_v60 = vld [vmem:[#allocation4 + $0x2a0] ss:$16 sps:$4 sm:$0xff]  }
 0x24c   : > { %v869_v9 = vrot.slane %v844_v6, 7  ;;  %v893_v10 = vrot.slane %v844_v6, 1  ;;  %v846_v11 = vpop.f32.mrb[5].mxu1  ;;  %v3182_v12 = vpack.c.bf16 %v868_v5, %v864_v55  ;;  %v3500_v55 = vld [vmem:[#allocation4 + $0x280] ss:$16 sps:$4 sm:$0xff]  }
 0x24d   : > { %v871_v14 = vrot.slane %v846_v11, 7  ;;  %v895_v15 = vrot.slane %v846_v11, 1  ;;  %v3512_v2 = vld [vmem:[#allocation4 + $0x2c0] ss:$16 sps:$4 sm:$0xff]   ;;  %v3523_v5 = vld [vmem:[#allocation4 + $0x2ec] ss:$16 sps:$4 sm:$0xff]  }
 0x24e   : > { %v894_v18 = vsel %vm309_vm6, %v888_v57, %v893_v10  ;;  %3183 = vmatprep.mubr.msk.bf16.mxu1 %vm3912_vm5, %v3182_v12  ;;  %3197 = vmatprep.mubr.msk.bf16.mxu0 %vm3912_vm5, %v3182_v12  ;;  %v870_v19 = vsel %vm302_vm2, %v865_v56, %v869_v9  ;;  %v3503_v56 = vld [vmem:[#allocation4 + $0x288] ss:$16 sps:$4 sm:$0xff]   ;;  %v3508_v57 = vld [vmem:[#allocation4 + $0x2a4] ss:$16 sps:$4 sm:$0xff]  }
 0x24f   : > { %v4036_v20 = vpack.c.bf16 %v894_v18, %v889_v3  ;;  %v850_v21 = vpop.f32.mrb[6].mxu1  ;;  %3187 = vmatmul.mubr.msk.bf16.vlgmr.msra.gmra.mrb[8].mxu1 %vm3912_vm5, %v3186_v4  ;;  %3201 = vmatmul.mubr.msk.bf16.vlgmr.msra.gmra.mrb[4].mxu0 %vm3912_vm5, %v3186_v4  ;;  %v872_v23 = vsel %vm302_vm2, %v867_v62, %v871_v14  ;;  %v896_v24 = vsel %vm309_vm6, %v891_v63, %v895_v15  ;;  %v3509_v62 = vld [vmem:[#allocation4 + $0x2a8] ss:$16 sps:$4 sm:$0xff]   ;;  %v3514_v63 = vld [vmem:[#allocation4 + $0x2c4] ss:$16 sps:$4 sm:$0xff]  }
 0x250   : > { %v873_v25 = vrot.slane %v850_v21, 7  ;;  %v897_v26 = vrot.slane %v850_v21, 1  ;;  %v4044_v27 = vpack.c.bf16 %v850_v21, %v844_v6  ;;  %2175 = vmatpush1.bf16.msra.mxu1 %v3476_v7  ;;  %2334 = vmatpush1.bf16.msra.mxu0 %v3479_v13  ;;  %v852_v28 = vpop.f32.mrb[7].mxu1  ;;  %v4046_v30 = vpack.c.bf16 %v896_v24, %v892_v8  ;;  %v3515_v3 = vld [vmem:[#allocation4 + $0x2c8] ss:$16 sps:$4 sm:$0xff]  }
 0x251   : > { %v875_v33 = vrot.slane %v852_v28, 7  ;;  %v899_v35 = vrot.slane %v852_v28, 1  ;;  %v4048_v36 = vpack.c.bf16 %v852_v28, %v846_v11  ;;  %2176 = vmatprep.subr.bf16.mxu1 %v3484_v16  ;;  %2335 = vmatprep.subr.bf16.mxu0 %v3487_v17  ;;  %v3520_v4 = vld [vmem:[#allocation4 + $0x2e4] ss:$16 sps:$4 sm:$0xff]   ;;  %v3518_v6 = vld [vmem:[#allocation4 + $0x2e0] ss:$16 sps:$4 sm:$0xff]  }
 0x252   : > { %v898_v38 = vsel %vm309_vm6, %v893_v10, %v897_v26  ;;  %v874_v40 = vsel %vm302_vm2, %v869_v9, %v873_v25  ;;  %v3521_v7 = vld [vmem:[#allocation4 + $0x2e8] ss:$16 sps:$4 sm:$0xff]   ;;  %v3526_v8 = vld [vmem:[#allocation4 + $0x304] ss:$16 sps:$4 sm:$0xff]   ;;  %v3529_v9 = vld [vmem:[#allocation4 + $0x30c] ss:$16 sps:$4 sm:$0xff]  }
 0x253   : > { %v4052_v41 = vpack.c.bf16 %v897_v26, %v898_v38  ;;  %v900_v42 = vsel %vm309_vm6, %v895_v15, %v899_v35  ;;  %v876_v43 = vsel %vm302_vm2, %v871_v14, %v875_v33  ;;  %v917_v44 = vpack.c.bf16 %v874_v40, %v870_v19  ;;  %v3524_v10 = vld [vmem:[#allocation4 + $0x300] ss:$16 sps:$4 sm:$0xff]   ;;  %v3527_v11 = vld [vmem:[#allocation4 + $0x308] ss:$16 sps:$4 sm:$0xff]   ;;  %v3532_v12 = vld [vmem:[#allocation4 + $0x324] ss:$16 sps:$4 sm:$0xff]  }
 0x254   : > { %v4056_v45 = vpack.c.bf16 %v899_v35, %v900_v42  ;;  %2177 = vmatpush1.bf16.msra.mxu1 %v3482_v22  ;;  %2336 = vmatpush1.bf16.msra.mxu0 %v3485_v29  ;;  %v918_v46 = vpack.c.bf16 %v876_v43, %v872_v23  ;;  %v3535_v13 = vld [vmem:[#allocation4 + $0x32c] ss:$16 sps:$4 sm:$0xff]   ;;  %v3530_v14 = vld [vmem:[#allocation4 + $0x320] ss:$16 sps:$4 sm:$0xff]   ;;  %v3533_v15 = vld [vmem:[#allocation4 + $0x328] ss:$16 sps:$4 sm:$0xff]  }
 0x255   : > { %2178 = vmatprep.subr.bf16.mxu1 %v3490_v39  ;;  %2337 = vmatprep.subr.bf16.mxu0 %v3493_v37  ;;  %v3538_v16 = vld [vmem:[#allocation4 + $0x344] ss:$16 sps:$4 sm:$0xff]   ;;  %v3541_v17 = vld [vmem:[#allocation4 + $0x34c] ss:$16 sps:$4 sm:$0xff]   ;;  %v3536_v18 = vld [vmem:[#allocation4 + $0x340] ss:$16 sps:$4 sm:$0xff]  }
 0x256   : > { %2163 = vmatprep.mubr.bf16.mxu1 %v918_v46  ;;  %2322 = vmatprep.mubr.bf16.mxu0 %v918_v46  ;;  %v3539_v19 = vld [vmem:[#allocation4 + $0x348] ss:$16 sps:$4 sm:$0xff]   ;;  %v3544_v21 = vld [vmem:[#allocation4 + $0x364] ss:$16 sps:$4 sm:$0xff]   ;;  %v3547_v22 = vld [vmem:[#allocation4 + $0x36c] ss:$16 sps:$4 sm:$0xff]  }
 0x257   : > { %2164 = vmatmul.mubr.bf16.gmra.mrb[12].mxu1 %v917_v44  ;;  %2323 = vmatmul.mubr.bf16.gmra.mrb[8].mxu0 %v917_v44  ;;  %v3542_v23 = vld [vmem:[#allocation4 + $0x360] ss:$16 sps:$4 sm:$0xff]   ;;  %v3545_v24 = vld [vmem:[#allocation4 + $0x368] ss:$16 sps:$4 sm:$0xff]   ;;  %v3550_v25 = vld [vmem:[#allocation4 + $0x384] ss:$16 sps:$4 sm:$0xff]  }
 0x258   : > { %2179 = vmatpush1.bf16.msra.mxu1 %v3488_v47  ;;  %2338 = vmatpush1.bf16.msra.mxu0 %v3491_v48  ;;  %v3553_v26 = vld [vmem:[#allocation4 + $0x38c] ss:$16 sps:$4 sm:$0xff]   ;;  %v3548_v28 = vld [vmem:[#allocation4 + $0x380] ss:$16 sps:$4 sm:$0xff]   ;;  %v3551_v29 = vld [vmem:[#allocation4 + $0x388] ss:$16 sps:$4 sm:$0xff]  }
 0x259   : > { %2206 = vmatprep.mubr.bf16.mxu1 %v4024_v0  ;;  %2365 = vmatprep.mubr.bf16.mxu0 %v4024_v0  ;;  %v3517_v0 = vld [vmem:[#allocation4 + $0x2cc] ss:$16 sps:$4 sm:$0xff]   ;;  %v3556_v33 = vld [vmem:[#allocation4 + $0x3a4] ss:$16 sps:$4 sm:$0xff]   ;;  %v3554_v39 = vld [vmem:[#allocation4 + $0x3a0] ss:$16 sps:$4 sm:$0xff]  }
 0x25a   : > { %2180 = vmatprep.subr.bf16.mxu1 %v3496_v49  ;;  %2339 = vmatprep.subr.bf16.mxu0 %v3499_v50  ;;  %v3559_v35 = vld [vmem:[#allocation4 + $0x3ac] ss:$16 sps:$4 sm:$0xff]   ;;  %v3557_v37 = vld [vmem:[#allocation4 + $0x3a8] ss:$16 sps:$4 sm:$0xff]   ;;  %v3562_v38 = vld [vmem:[#allocation4 + $0x3c4] ss:$16 sps:$4 sm:$0xff]  }
 0x25b   : > { %v3565_v40 = vld [vmem:[#allocation4 + $0x3cc] ss:$16 sps:$4 sm:$0xff]   ;;  %v3560_v42 = vld [vmem:[#allocation4 + $0x3c0] ss:$16 sps:$4 sm:$0xff]   ;;  %v3563_v43 = vld [vmem:[#allocation4 + $0x3c8] ss:$16 sps:$4 sm:$0xff]  }
 0x25c   : > { %2181 = vmatpush1.bf16.msra.mxu1 %v3494_v51  ;;  %2340 = vmatpush1.bf16.msra.mxu0 %v3497_v52  ;;  %v3568_v44 = vld [vmem:[#allocation4 + $0x3e4] ss:$16 sps:$4 sm:$0xff]   ;;  %v3571_v46 = vld [vmem:[#allocation4 + $0x3ec] ss:$16 sps:$4 sm:$0xff]   ;;  %v3566_v47 = vld [vmem:[#allocation4 + $0x3e0] ss:$16 sps:$4 sm:$0xff]  }
 0x25d   : > { %2182 = vmatprep.subr.bf16.mxu1 %v3502_v53  ;;  %2341 = vmatprep.subr.bf16.mxu0 %v3505_v54  ;;  %v3569_v48 = vld [vmem:[#allocation4 + $0x3e8] ss:$16 sps:$4 sm:$0xff]   ;;  %v3574_v49 = vld [vmem:[#allocation4 + $0x404] ss:$16 sps:$4 sm:$0xff]   ;;  %v3577_v50 = vld [vmem:[#allocation4 + $0x40c] ss:$16 sps:$4 sm:$0xff]  }
 0x25e   : > { %v3572_v51 = vld [vmem:[#allocation4 + $0x400] ss:$16 sps:$4 sm:$0xff]   ;;  %v3575_v52 = vld [vmem:[#allocation4 + $0x408] ss:$16 sps:$4 sm:$0xff]   ;;  %v3580_v53 = vld [vmem:[#allocation4 + $0x424] ss:$16 sps:$4 sm:$0xff]  }
 0x25f   : > { %v3583_v54 = vld [vmem:[#allocation4 + $0x42c] ss:$16 sps:$4 sm:$0xff]  }
 0x260   : > { %2183 = vmatpush1.bf16.msra.mxu1 %v3500_v55  ;;  %2342 = vmatpush1.bf16.msra.mxu0 %v3503_v56  ;;  %v3578_v55 = vld [vmem:[#allocation4 + $0x420] ss:$16 sps:$4 sm:$0xff]   ;;  %v3581_v56 = vld [vmem:[#allocation4 + $0x428] ss:$16 sps:$4 sm:$0xff]  }
 0x261   : > { %2184 = vmatprep.subr.bf16.mxu1 %v3508_v57  ;;  %2343 = vmatprep.subr.bf16.mxu0 %v3511_v59  ;;  %v3586_v57 = vld [vmem:[#allocation4 + $0x444] ss:$16 sps:$4 sm:$0xff]   ;;  %v3589_v59 = vld [vmem:[#allocation4 + $0x44c] ss:$16 sps:$4 sm:$0xff]  }
 0x264   : > { %2185 = vmatpush1.bf16.msra.mxu1 %v3506_v60  ;;  %2344 = vmatpush1.bf16.msra.mxu0 %v3509_v62  ;;  %v3584_v60 = vld [vmem:[#allocation4 + $0x440] ss:$16 sps:$4 sm:$0xff]   ;;  %v3587_v62 = vld [vmem:[#allocation4 + $0x448] ss:$16 sps:$4 sm:$0xff]  }
 0x265   : > { %2186 = vmatprep.subr.bf16.mxu1 %v3514_v63  ;;  %2345 = vmatprep.subr.bf16.mxu0 %v3517_v0  ;;  %v3592_v63 = vld [vmem:[#allocation4 + $0x464] ss:$16 sps:$4 sm:$0xff]   ;;  %v3593_v0 = vld [vmem:[#allocation4 + $0x468] ss:$16 sps:$4 sm:$0xff]  }
 0x268   : > { %2187 = vmatpush1.bf16.msra.mxu1 %v3512_v2  ;;  %2346 = vmatpush1.bf16.msra.mxu0 %v3515_v3  ;;  %v3598_v2 = vld [vmem:[#allocation4 + $0x484] ss:$16 sps:$4 sm:$0xff]   ;;  %v3601_v3 = vld [vmem:[#allocation4 + $0x48c] ss:$16 sps:$4 sm:$0xff]  }
 0x269   : > { %2188 = vmatprep.subr.bf16.mxu1 %v3520_v4  ;;  %2347 = vmatprep.subr.bf16.mxu0 %v3523_v5  ;;  %v3596_v4 = vld [vmem:[#allocation4 + $0x480] ss:$16 sps:$4 sm:$0xff]   ;;  %v3599_v5 = vld [vmem:[#allocation4 + $0x488] ss:$16 sps:$4 sm:$0xff]  }
 0x26c   : > { %2189 = vmatpush1.bf16.msra.mxu1 %v3518_v6  ;;  %2348 = vmatpush1.bf16.msra.mxu0 %v3521_v7  ;;  %v3604_v6 = vld [vmem:[#allocation4 + $0x4a4] ss:$16 sps:$4 sm:$0xff]   ;;  %v3602_v7 = vld [vmem:[#allocation4 + $0x4a0] ss:$16 sps:$4 sm:$0xff]  }
 0x26d   : > { %2190 = vmatprep.subr.bf16.mxu1 %v3526_v8  ;;  %2349 = vmatprep.subr.bf16.mxu0 %v3529_v9  ;;  %v3605_v8 = vld [vmem:[#allocation4 + $0x4a8] ss:$16 sps:$4 sm:$0xff]   ;;  %v3610_v9 = vld [vmem:[#allocation4 + $0x4c4] ss:$16 sps:$4 sm:$0xff]  }
 0x270   : > { %2191 = vmatpush1.bf16.msra.mxu1 %v3524_v10  ;;  %2350 = vmatpush1.bf16.msra.mxu0 %v3527_v11  ;;  %v3608_v10 = vld [vmem:[#allocation4 + $0x4c0] ss:$16 sps:$4 sm:$0xff]   ;;  %v3611_v11 = vld [vmem:[#allocation4 + $0x4c8] ss:$16 sps:$4 sm:$0xff]  }
 0x271   : > { %2192 = vmatprep.subr.bf16.mxu1 %v3532_v12  ;;  %2351 = vmatprep.subr.bf16.mxu0 %v3535_v13  ;;  %v3616_v12 = vld [vmem:[#allocation4 + $0x4e4] ss:$16 sps:$4 sm:$0xff]   ;;  %v3619_v13 = vld [vmem:[#allocation4 + $0x4ec] ss:$16 sps:$4 sm:$0xff]  }
 0x274   : > { %2193 = vmatpush1.bf16.msra.mxu1 %v3530_v14  ;;  %2352 = vmatpush1.bf16.msra.mxu0 %v3533_v15  ;;  %v3614_v14 = vld [vmem:[#allocation4 + $0x4e0] ss:$16 sps:$4 sm:$0xff]   ;;  %v3617_v15 = vld [vmem:[#allocation4 + $0x4e8] ss:$16 sps:$4 sm:$0xff]  }
 0x275   : > { %2194 = vmatprep.subr.bf16.mxu1 %v3538_v16  ;;  %2353 = vmatprep.subr.bf16.mxu0 %v3541_v17  ;;  %v3622_v16 = vld [vmem:[#allocation4 + $0x504] ss:$16 sps:$4 sm:$0xff]   ;;  %v3625_v17 = vld [vmem:[#allocation4 + $0x50c] ss:$16 sps:$4 sm:$0xff]  }
 0x278   : > { %2195 = vmatpush1.bf16.msra.mxu1 %v3536_v18  ;;  %2354 = vmatpush1.bf16.msra.mxu0 %v3539_v19  ;;  %v3620_v18 = vld [vmem:[#allocation4 + $0x500] ss:$16 sps:$4 sm:$0xff]   ;;  %v3623_v19 = vld [vmem:[#allocation4 + $0x508] ss:$16 sps:$4 sm:$0xff]  }
 0x279   : > { %2196 = vmatprep.subr.bf16.mxu1 %v3544_v21  ;;  %2355 = vmatprep.subr.bf16.mxu0 %v3547_v22  ;;  %v3628_v21 = vld [vmem:[#allocation4 + $0x524] ss:$16 sps:$4 sm:$0xff]   ;;  %v3631_v22 = vld [vmem:[#allocation4 + $0x52c] ss:$16 sps:$4 sm:$0xff]  }
 0x27c   : > { %2197 = vmatpush1.bf16.msra.mxu1 %v3542_v23  ;;  %2356 = vmatpush1.bf16.msra.mxu0 %v3545_v24  ;;  %v3626_v23 = vld [vmem:[#allocation4 + $0x520] ss:$16 sps:$4 sm:$0xff]   ;;  %v3629_v24 = vld [vmem:[#allocation4 + $0x528] ss:$16 sps:$4 sm:$0xff]  }
 0x27d   : > { %2198 = vmatprep.subr.bf16.mxu1 %v3550_v25  ;;  %2357 = vmatprep.subr.bf16.mxu0 %v3553_v26  ;;  %v3634_v25 = vld [vmem:[#allocation4 + $0x544] ss:$16 sps:$4 sm:$0xff]   ;;  %v3637_v26 = vld [vmem:[#allocation4 + $0x54c] ss:$16 sps:$4 sm:$0xff]  }
 0x280   : > { %2199 = vmatpush1.bf16.msra.mxu1 %v3548_v28  ;;  %2358 = vmatpush1.bf16.msra.mxu0 %v3551_v29  ;;  %v3632_v28 = vld [vmem:[#allocation4 + $0x540] ss:$16 sps:$4 sm:$0xff]   ;;  %v3635_v29 = vld [vmem:[#allocation4 + $0x548] ss:$16 sps:$4 sm:$0xff]  }
 0x281   : > { %2200 = vmatprep.subr.bf16.mxu1 %v3556_v33  ;;  %2359 = vmatprep.subr.bf16.mxu0 %v3559_v35  ;;  %v3640_v33 = vld [vmem:[#allocation4 + $0x564] ss:$16 sps:$4 sm:$0xff]   ;;  %v3643_v35 = vld [vmem:[#allocation4 + $0x56c] ss:$16 sps:$4 sm:$0xff]  }
 0x284   : > { %2201 = vmatpush1.bf16.msra.mxu1 %v3554_v39  ;;  %2360 = vmatpush1.bf16.msra.mxu0 %v3557_v37  ;;  %v3638_v39 = vld [vmem:[#allocation4 + $0x560] ss:$16 sps:$4 sm:$0xff]   ;;  %v3641_v37 = vld [vmem:[#allocation4 + $0x568] ss:$16 sps:$4 sm:$0xff]  }
 0x285   : > { %2202 = vmatprep.subr.bf16.mxu1 %v3562_v38  ;;  %2361 = vmatprep.subr.bf16.mxu0 %v3565_v40  ;;  %v3646_v38 = vld [vmem:[#allocation4 + $0x584] ss:$16 sps:$4 sm:$0xff]   ;;  %v3649_v40 = vld [vmem:[#allocation4 + $0x58c] ss:$16 sps:$4 sm:$0xff]  }
 0x288   : > { %2203 = vmatpush1.bf16.msra.mxu1 %v3560_v42  ;;  %2362 = vmatpush1.bf16.msra.mxu0 %v3563_v43  ;;  %v3644_v42 = vld [vmem:[#allocation4 + $0x580] ss:$16 sps:$4 sm:$0xff]   ;;  %v3647_v43 = vld [vmem:[#allocation4 + $0x588] ss:$16 sps:$4 sm:$0xff]  }
 0x289   : > { %2204 = vmatprep.subr.bf16.mxu1 %v3568_v44  ;;  %2363 = vmatprep.subr.bf16.mxu0 %v3571_v46  ;;  %v3652_v44 = vld [vmem:[#allocation4 + $0x5a4] ss:$16 sps:$4 sm:$0xff]   ;;  %v3655_v46 = vld [vmem:[#allocation4 + $0x5ac] ss:$16 sps:$4 sm:$0xff]  }
 0x28c   : > { %2205 = vmatpush1.bf16.msra.mxu1 %v3566_v47  ;;  %2364 = vmatpush1.bf16.msra.mxu0 %v3569_v48  ;;  %v3650_v47 = vld [vmem:[#allocation4 + $0x5a0] ss:$16 sps:$4 sm:$0xff]   ;;  %v3653_v48 = vld [vmem:[#allocation4 + $0x5a8] ss:$16 sps:$4 sm:$0xff]  }
 0x28d   : > { %2227 = vmatprep.subr.bf16.mxu1 %v3574_v49  ;;  %2386 = vmatprep.subr.bf16.mxu0 %v3577_v50  ;;  %v3658_v49 = vld [vmem:[#allocation4 + $0x5c4] ss:$16 sps:$4 sm:$0xff]   ;;  %v3661_v50 = vld [vmem:[#allocation4 + $0x5cc] ss:$16 sps:$4 sm:$0xff]  }
 0x28f   : > { %2207 = vmatmul.mubr.bf16.vlgmr.msra.gmra.mrb[8].mxu1 %v4022_v58  ;;  %2366 = vmatmul.mubr.bf16.vlgmr.msra.gmra.mrb[4].mxu0 %v4022_v58  ;;  %v3595_v58 = vld [vmem:[#allocation4 + $0x46c] ss:$16 sps:$4 sm:$0xff]  }
 0x290   : > { %2216 = vmatprep.mubr.bf16.mxu1 %v4048_v36  ;;  %2228 = vmatpush1.bf16.msra.mxu1 %v3572_v51  ;;  %v3656_v51 = vld [vmem:[#allocation4 + $0x5c0] ss:$16 sps:$4 sm:$0xff]  }
 0x291   : > { %2375 = vmatprep.mubr.bf16.mxu0 %v4048_v36  ;;  %2387 = vmatpush1.bf16.msra.mxu0 %v3575_v52  ;;  %v3590_v36 = vld [vmem:[#allocation4 + $0x460] ss:$16 sps:$4 sm:$0xff]   ;;  %v3659_v52 = vld [vmem:[#allocation4 + $0x5c8] ss:$16 sps:$4 sm:$0xff]  }
 0x292   : > { %2229 = vmatprep.subr.bf16.mxu1 %v3580_v53  ;;  %2388 = vmatprep.subr.bf16.mxu0 %v3583_v54  ;;  %v3664_v53 = vld [vmem:[#allocation4 + $0x5e4] ss:$16 sps:$4 sm:$0xff]   ;;  %v3667_v54 = vld [vmem:[#allocation4 + $0x5ec] ss:$16 sps:$4 sm:$0xff]  }
 0x294   : > { %2230 = vmatpush1.bf16.msra.mxu1 %v3578_v55  ;;  %v3662_v55 = vld [vmem:[#allocation4 + $0x5e0] ss:$16 sps:$4 sm:$0xff]  }
 0x295   : > { %2389 = vmatpush1.bf16.msra.mxu0 %v3581_v56  ;;  %2231 = vmatprep.subr.bf16.mxu1 %v3586_v57  ;;  %v3665_v56 = vld [vmem:[#allocation4 + $0x5e8] ss:$16 sps:$4 sm:$0xff]   ;;  %v1151_v57 = vsub.s32 2, %v3980_v31 }
 0x296   : > { %2390 = vmatprep.subr.bf16.mxu0 %v3589_v59  ;;  %v1155_v59 = vsub.s32 3, %v3980_v31 }
 0x297   : > { %2217 = vmatmul.mubr.bf16.gmra.mrb[12].mxu1 %v4044_v27  ;;  %2376 = vmatmul.mubr.bf16.gmra.mrb[8].mxu0 %v4044_v27  ;;  %v3607_v27 = vld [vmem:[#allocation4 + $0x4ac] ss:$16 sps:$4 sm:$0xff]  }
 0x298   : > { %2232 = vmatpush1.bf16.msra.mxu1 %v3584_v60  ;;  %2259 = vmatprep.mubr.bf16.mxu1 %v4046_v30  ;;  %v3148_v60 = vld [vmem:[%s4264_s5 + $0x1] ss:$4 sm:$0xf] }
 0x299   : > { %2391 = vmatpush1.bf16.msra.mxu0 %v3587_v62  ;;  %2418 = vmatprep.mubr.bf16.mxu0 %v4046_v30  ;;  %v3613_v30 = vld [vmem:[#allocation4 + $0x4cc] ss:$16 sps:$4 sm:$0xff]  }
 0x29a   : > { %2233 = vmatprep.subr.bf16.mxu1 %v3592_v63  ;;  %2392 = vmatprep.subr.bf16.mxu0 %v3595_v58 }
 0x29c   : > { %2234 = vmatpush1.bf16.msra.mxu1 %v3590_v36  ;;  %v4106_v36 = vrot.slane %v3148_v60, %v3983_v32 }
 0x29d   : > { %2393 = vmatpush1.bf16.msra.mxu0 %v3593_v0  ;;  %2235 = vmatprep.subr.bf16.mxu1 %v3598_v2  ;;  %v4108_v2 = vrot.slane %v3148_v60, %v1151_v57 }
 0x29e   : > { %2394 = vmatprep.subr.bf16.mxu0 %v3601_v3 }
 0x2a0   : > { %2236 = vmatpush1.bf16.msra.mxu1 %v3596_v4  ;;  %v4111_v4 = vrot.slane %v3148_v60, %v3989_v34 }
 0x2a1   : > { %2395 = vmatpush1.bf16.msra.mxu0 %v3599_v5  ;;  %2237 = vmatprep.subr.bf16.mxu1 %v3604_v6 }
 0x2a2   : > { %2396 = vmatprep.subr.bf16.mxu0 %v3607_v27 }
 0x2a4   : > { %2238 = vmatpush1.bf16.msra.mxu1 %v3602_v7 }
 0x2a5   : > { %2397 = vmatpush1.bf16.msra.mxu0 %v3605_v8  ;;  %2239 = vmatprep.subr.bf16.mxu1 %v3610_v9  ;;  %v4118_v8 = vrot.slane %v3148_v60, %v1155_v59 }
 0x2a6   : > { %2398 = vmatprep.subr.bf16.mxu0 %v3613_v30 }
 0x2a8   : > { %2240 = vmatpush1.bf16.msra.mxu1 %v3608_v10 }
 0x2a9   : > { %2399 = vmatpush1.bf16.msra.mxu0 %v3611_v11  ;;  %2241 = vmatprep.subr.bf16.mxu1 %v3616_v12 }
 0x2aa   : > { %2400 = vmatprep.subr.bf16.mxu0 %v3619_v13 }
 0x2ac   : > { %2242 = vmatpush1.bf16.msra.mxu1 %v3614_v14 }
 0x2ad   : > { %2401 = vmatpush1.bf16.msra.mxu0 %v3617_v15  ;;  %2243 = vmatprep.subr.bf16.mxu1 %v3622_v16 }
 0x2ae   : > { %2402 = vmatprep.subr.bf16.mxu0 %v3625_v17 }
 0x2b0   : > { %2244 = vmatpush1.bf16.msra.mxu1 %v3620_v18 }
 0x2b1   : > { %2403 = vmatpush1.bf16.msra.mxu0 %v3623_v19  ;;  %2245 = vmatprep.subr.bf16.mxu1 %v3628_v21 }
 0x2b2   : > { %2404 = vmatprep.subr.bf16.mxu0 %v3631_v22 }
 0x2b4   : > { %2246 = vmatpush1.bf16.msra.mxu1 %v3626_v23 }
 0x2b5   : > { %2405 = vmatpush1.bf16.msra.mxu0 %v3629_v24  ;;  %2247 = vmatprep.subr.bf16.mxu1 %v3634_v25 }
 0x2b6   : > { %2406 = vmatprep.subr.bf16.mxu0 %v3637_v26 }
 0x2b8   : > { %2248 = vmatpush1.bf16.msra.mxu1 %v3632_v28 }
 0x2b9   : > { %2407 = vmatpush1.bf16.msra.mxu0 %v3635_v29  ;;  %2249 = vmatprep.subr.bf16.mxu1 %v3640_v33 }
 0x2ba   : > { %2408 = vmatprep.subr.bf16.mxu0 %v3643_v35 }
 0x2bc   : > { %2250 = vmatpush1.bf16.msra.mxu1 %v3638_v39 }
 0x2bd   : > { %2409 = vmatpush1.bf16.msra.mxu0 %v3641_v37  ;;  %2251 = vmatprep.subr.bf16.mxu1 %v3646_v38 }
 0x2be   : > { %2410 = vmatprep.subr.bf16.mxu0 %v3649_v40 }
 0x2c0   : > { %2252 = vmatpush1.bf16.msra.mxu1 %v3644_v42 }
 0x2c1   : > { %2411 = vmatpush1.bf16.msra.mxu0 %v3647_v43  ;;  %2253 = vmatprep.subr.bf16.mxu1 %v3652_v44 }
 0x2c2   : > { %2412 = vmatprep.subr.bf16.mxu0 %v3655_v46 }
 0x2c4   : > { %2254 = vmatpush1.bf16.msra.mxu1 %v3650_v47 }
 0x2c5   : > { %2413 = vmatpush1.bf16.msra.mxu0 %v3653_v48  ;;  %2255 = vmatprep.subr.bf16.mxu1 %v3658_v49 }
 0x2c6   : > { %2414 = vmatprep.subr.bf16.mxu0 %v3661_v50 }
 0x2c8   : > { %2256 = vmatpush1.bf16.msra.mxu1 %v3656_v51 }
 0x2c9   : > { %2415 = vmatpush1.bf16.msra.mxu0 %v3659_v52  ;;  %2257 = vmatprep.subr.bf16.mxu1 %v3664_v53 }
 0x2ca   : > { %2416 = vmatprep.subr.bf16.mxu0 %v3667_v54 }
 0x2cc   : > { %2258 = vmatpush1.bf16.msra.mxu1 %v3662_v55 }
 0x2cd   : > { %2417 = vmatpush1.bf16.msra.mxu0 %v3665_v56 }
 0x2cf   : > { %2260 = vmatmul.mubr.bf16.vlgmr.msra.gmra.mrb[8].mxu1 %v4036_v20 }
 0x2d0   : > { %2419 = vmatmul.mubr.bf16.vlgmr.msra.gmra.mrb[4].mxu0 %v4036_v20  ;;  %3190 = vmatprep.mubr.msk.bf16.mxu1 %vm3969_vm7, %v4056_v45  ;;  %v1139_v20 = vld [vmem:[%s4264_s5] ss:$4 sm:$0xf] }
 0x2d1   : > { %3204 = vmatprep.mubr.msk.bf16.mxu0 %vm3969_vm7, %v4056_v45  ;;  %v4089_v45 = vrot.slane %v1139_v20, %v3983_v32  ;;  %v4094_v62 = vrot.slane %v1139_v20, %v1151_v57  ;;  %v4097_v61 = vrot.slane %v1139_v20, %v3989_v34  ;;  %v4102_v63 = vrot.slane %v1139_v20, %v1155_v59 }
 0x2d7   : > { %3193 = vmatmul.mubr.msk.bf16.gmra.mrb[12].mxu1 %vm3969_vm7, %v4052_v41 }
 0x2d8   : > { %3207 = vmatmul.mubr.msk.bf16.gmra.mrb[8].mxu0 %vm3969_vm7, %v4052_v41  ;;  %2630 = vmatprep.mubr.f32.mxu1 %v3713_v1  ;;  %v3149_v41 = vld [vmem:[%s4264_s5 + $0x2] ss:$4 sm:$0xf] }
 0x2d9   : > { %v4114_v5 = vrot.slane %v3149_v41, %v3983_v32  ;;  %v4120_v10 = vrot.slane %v3149_v41, %v1151_v57  ;;  %v2504_v29 = vrot.slane %v3149_v41, %v3989_v34  ;;  %v2512_v38 = vrot.slane %v3149_v41, %v1155_v59 }
 0x3a2   : > { %v2261_v58 = vpop.f32.mrb[8].mxu1 }
 0x3a3   : > { %v3232_v31 = vadd.f32 %v2261_v58, %v4089_v45  ;;  %v2420_v0 = vpop.f32.mrb[4].mxu0  ;;  %v2263_v3 = vpop.f32.mrb[9].mxu1 }
 0x3a4   : > { %v3240_v6 = vadd.f32 %v2420_v0, %v4094_v62  ;;  %v3233_v27 = vadd.f32 %v2263_v3, %v4097_v61  ;;  %v2422_v7 = vpop.f32.mrb[5].mxu0  ;;  %v2265_v9 = vpop.f32.mrb[10].mxu1 }
 0x3a5   : > { %v2439_v30 = vmax.f32 %v3232_v31, 0.0  ;;  %v3241_v11 = vadd.f32 %v2422_v7, %v4102_v63  ;;  %v3234_v12 = vadd.f32 %v2265_v9, %v4089_v45  ;;  %v2424_v13 = vpop.f32.mrb[6].mxu0  ;;  %v2267_v14 = vpop.f32.mrb[11].mxu1 }
 0x3a6   : > { %v2441_v15 = vmax.f32 %v3240_v6, 0.0  ;;  %v2440_v32 = vmax.f32 %v3233_v27, 0.0  ;;  %v3242_v16 = vadd.f32 %v2424_v13, %v4094_v62  ;;  %v3235_v17 = vadd.f32 %v2267_v14, %v4097_v61  ;;  %v2426_v18 = vpop.f32.mrb[7].mxu0 }
 0x3a7   : > { %v2478_v19 = vmul.f32 %v4106_v36, %v2439_v30  ;;  %v2442_v21 = vmax.f32 %v3241_v11, 0.0  ;;  %v2443_v22 = vmax.f32 %v3234_v12, 0.0  ;;  %v3243_v23 = vadd.f32 %v2426_v18, %v4102_v63 }
 0x3a8   : > { %v2480_v24 = vmul.f32 %v4108_v2, %v2441_v15  ;;  %v2445_v25 = vmax.f32 %v3242_v16, 0.0  ;;  %v2444_v26 = vmax.f32 %v3235_v17, 0.0  ;;  %v2479_v28 = vmul.f32 %v4111_v4, %v2440_v32 }
 0x3a9   : > { %v2482_v33 = vmul.f32 %v4106_v36, %v2443_v22  ;;  %v2446_v35 = vmax.f32 %v3243_v23, 0.0  ;;  %v2517_v39 = vadd.f32 %v4114_v5, %v2478_v19  ;;  %v2481_v37 = vmul.f32 %v4118_v8, %v2442_v21 }
 0x3aa   : > { %v2484_v40 = vmul.f32 %v4108_v2, %v2445_v25  ;;  %v2271_v42 = vpop.f32.mrb[12].mxu1  ;;  %v4136_v43 = vadd.f32 %v4120_v10, %v2480_v24  ;;  %v2483_v46 = vmul.f32 %v4111_v4, %v2444_v26  ;;  %v2518_v55 = vadd.f32 %v2504_v29, %v2479_v28 }
 0x3ab   : > { %v2521_v44 = vadd.f32 %v4114_v5, %v2482_v33  ;;  %v3236_v34 = vadd.f32 %v2271_v42, %v4089_v45  ;;  %v2430_v47 = vpop.f32.mrb[8].mxu0  ;;  %v2273_v48 = vpop.f32.mrb[13].mxu1  ;;  %v2485_v50 = vmul.f32 %v4118_v8, %v2446_v35  ;;  %v2539_v42 = vld [vmem:[%s4265_s6 + $0x30] sm:$0xff] }
 0x3ac   : > { %v2523_v49 = vadd.f32 %v4120_v10, %v2484_v40  ;;  %v3244_v51 = vadd.f32 %v2430_v47, %v4094_v62  ;;  %v3237_v52 = vadd.f32 %v2273_v48, %v4097_v61  ;;  %v2432_v53 = vpop.f32.mrb[9].mxu0  ;;  %v2275_v54 = vpop.f32.mrb[14].mxu1  ;;  %v2522_v6 = vadd.f32 %v2504_v29, %v2483_v46  ;;  %v2538_v40 = vld [vmem:[%s4265_s6 + $0x28] sm:$0xff] }
 0x3ad   : > { %v3214_v56 = vpack.c.bf16 %v2521_v44, %v2517_v39  ;;  %v2447_v20 = vmax.f32 %v3236_v34, 0.0  ;;  %v3245_v57 = vadd.f32 %v2432_v53, %v4102_v63  ;;  %v2434_v59 = vpop.f32.mrb[10].mxu0  ;;  %v2277_v60 = vpop.f32.mrb[15].mxu1  ;;  %v3238_v0 = vadd.f32 %v2275_v54, %v4089_v45 }
 0x3ae   : > { %v3222_v41 = vpack.c.bf16 %v2523_v49, %v4136_v43  ;;  %v2449_v58 = vmax.f32 %v3244_v51, 0.0  ;;  %v2448_v31 = vmax.f32 %v3237_v52, 0.0  ;;  %v2436_v3 = vpop.f32.mrb[11].mxu0  ;;  %v3246_v7 = vadd.f32 %v2434_v59, %v4094_v62  ;;  %v2540_v43 = vld [vmem:[%s4265_s6 + $0x38] sm:$0xff] }
 0x3af   : > { %v2450_v27 = vmax.f32 %v3245_v57, 0.0  ;;  %v3239_v9 = vadd.f32 %v2277_v60, %v4097_v61  ;;  %v2524_v30 = vadd.f32 %v2512_v38, %v2485_v50  ;;  %v2486_v11 = vmul.f32 %v4106_v36, %v2447_v20 }
 0x3b0   : > { %v2451_v12 = vmax.f32 %v3238_v0, 0.0  ;;  %v3247_v13 = vadd.f32 %v2436_v3, %v4102_v63  ;;  %v2488_v14 = vmul.f32 %v4108_v2, %v2449_v58  ;;  %v2487_v15 = vmul.f32 %v4111_v4, %v2448_v31 }
 0x3b1   : > { %v2453_v32 = vmax.f32 %v3246_v7, 0.0  ;;  %v2452_v16 = vmax.f32 %v3239_v9, 0.0  ;;  %v2520_v45 = vadd.f32 %v2512_v38, %v2481_v37  ;;  %v2489_v17 = vmul.f32 %v4118_v8, %v2450_v27 }
 0x3b2   : > { %v2490_v18 = vmul.f32 %v4106_v36, %v2451_v12  ;;  %v2454_v62 = vmax.f32 %v3247_v13, 0.0  ;;  %v3212_v21 = vpack.c.bf16 %v2522_v6, %v2518_v55  ;;  %v2525_v22 = vadd.f32 %v4114_v5, %v2486_v11 }
 0x3b3   : > { %v2492_v61 = vmul.f32 %v4108_v2, %v2453_v32  ;;  %v2491_v19 = vmul.f32 %v4111_v4, %v2452_v16  ;;  %v3220_v24 = vpack.c.bf16 %v2524_v30, %v2520_v45  ;;  %v2527_v25 = vadd.f32 %v4120_v10, %v2488_v14 }
 0x3b4   : > { %v2529_v63 = vadd.f32 %v4114_v5, %v2490_v18  ;;  %v2493_v23 = vmul.f32 %v4118_v8, %v2454_v62  ;;  %v2526_v26 = vadd.f32 %v2504_v29, %v2487_v15  ;;  %3213 = vmatprep.subr.bf16.mxu1 %v3212_v21  ;;  %v2528_v36 = vadd.f32 %v2512_v38, %v2489_v17  ;;  %v2533_v5 = vld [vmem:[%s4265_s6] sm:$0xff]  ;;  %v2534_v8 = vld [vmem:[%s4265_s6 + $0x8] sm:$0xff] }
 0x3b5   : > { %v2531_v28 = vadd.f32 %v4120_v10, %v2492_v61  ;;  %v2530_v33 = vadd.f32 %v2504_v29, %v2491_v19  ;;  %3215 = vmatpush1.bf16.msra.mxu1 %v3214_v56  ;;  %v2535_v10 = vld [vmem:[%s4265_s6 + $0x10] sm:$0xff]  ;;  %v2536_v29 = vld [vmem:[%s4265_s6 + $0x18] sm:$0xff] }
 0x3b6   : > { %v3218_v35 = vpack.c.bf16 %v2529_v63, %v2525_v22  ;;  %v2532_v2 = vadd.f32 %v2512_v38, %v2493_v23  ;;  %v2537_v38 = vld [vmem:[%s4265_s6 + $0x20] sm:$0xff] }
 0x3b7   : > { %v3226_v4 = vpack.c.bf16 %v2531_v28, %v2527_v25  ;;  %v3216_v39 = vpack.c.bf16 %v2530_v33, %v2526_v26 }
 0x3b8   : > { %v3224_v37 = vpack.c.bf16 %v2532_v2, %v2528_v36 }
 0x3b9   : > { %3217 = vmatprep.subr.bf16.mxu1 %v3216_v39 }
 0x3ba   : > { %3219 = vmatpush1.bf16.msra.mxu1 %v3218_v35 }
 0x3bb   : > { %3221 = vmatprep.subr.bf16.mxu1 %v3220_v24 }
 0x3bd   : > { %3150 = vmatmul.mubr.msk.f32.vlgmr.msra.gmra.mrb[16].mxu1 %vm2541_vm9, %v2533_v5 }
 0x3be   : > { %3223 = vmatpush1.bf16.msra.mxu1 %v3222_v41  ;;  %2636 = vmatprep.mubr.f32.mxu1 %v3713_v1 }
 0x3bf   : > { %3225 = vmatprep.subr.bf16.mxu1 %v3224_v37 }
 0x3c1   : > { %3151 = vmatmul.mubr.msk.f32.gmra.mrb[18].mxu1 %vm2541_vm9, %v2534_v8 }
 0x3c2   : > { %3227 = vmatpush1.bf16.msra.mxu1 %v3226_v4  ;;  %2642 = vmatprep.mubr.f32.mxu1 %v3713_v1 }
 0x3c5   : > { %3152 = vmatmul.mubr.msk.f32.gmra.mrb[20].mxu1 %vm2541_vm9, %v2535_v10 }
 0x3c6   : > { %2648 = vmatprep.mubr.f32.mxu1 %v3713_v1 }
 0x3c9   : > { %3153 = vmatmul.mubr.msk.f32.gmra.mrb[22].mxu1 %vm2541_vm9, %v2536_v29 }
 0x3ca   : > { %2654 = vmatprep.mubr.f32.mxu1 %v3713_v1 }
 0x3cd   : > { %3154 = vmatmul.mubr.msk.f32.gmra.mrb[24].mxu1 %vm2541_vm9, %v2537_v38 }
 0x3ce   : > { %2660 = vmatprep.mubr.f32.mxu1 %v3713_v1 }
 0x3d1   : > { %3155 = vmatmul.mubr.msk.f32.gmra.mrb[26].mxu1 %vm2541_vm9, %v2538_v40 }
 0x3d2   : > { %2666 = vmatprep.mubr.f32.mxu1 %v3713_v1 }
 0x3d5   : > { %3156 = vmatmul.mubr.msk.f32.gmra.mrb[28].mxu1 %vm2541_vm9, %v2539_v42 }
 0x3d6   : > { %2672 = vmatprep.mubr.f32.mxu1 %v3713_v1 }
 0x3d9   : > { %3157 = vmatmul.mubr.msk.f32.gmra.mrb[30].mxu1 %vm2541_vm9, %v2540_v43 }
 0x3da   : > { %2743 = vmatprep.mubr.f32.mxu1 %v3713_v1 }
 0x3dd   : > { %3158 = vmatmul.mubr.msk.f32.vlgmr.msra.gmra.mrb[32].mxu1 %vm2541_vm9, %v2533_v5 }
 0x3de   : > { %2749 = vmatprep.mubr.f32.mxu1 %v3713_v1 }
 0x3e1   : > { %3159 = vmatmul.mubr.msk.f32.gmra.mrb[34].mxu1 %vm2541_vm9, %v2534_v8 }
 0x3e2   : > { %2755 = vmatprep.mubr.f32.mxu1 %v3713_v1 }
 0x3e5   : > { %3160 = vmatmul.mubr.msk.f32.gmra.mrb[36].mxu1 %vm2541_vm9, %v2535_v10 }
 0x3e6   : > { %2761 = vmatprep.mubr.f32.mxu1 %v3713_v1 }
 0x3e9   : > { %3161 = vmatmul.mubr.msk.f32.gmra.mrb[38].mxu1 %vm2541_vm9, %v2536_v29 }
 0x3ea   : > { %2767 = vmatprep.mubr.f32.mxu1 %v3713_v1 }
 0x3ed   : > { %3162 = vmatmul.mubr.msk.f32.gmra.mrb[40].mxu1 %vm2541_vm9, %v2537_v38 }
 0x3ee   : > { %2773 = vmatprep.mubr.f32.mxu1 %v3713_v1 }
 0x3f1   : > { %3163 = vmatmul.mubr.msk.f32.gmra.mrb[42].mxu1 %vm2541_vm9, %v2538_v40 }
 0x3f2   : > { %2779 = vmatprep.mubr.f32.mxu1 %v3713_v1 }
 0x3f5   : > { %3164 = vmatmul.mubr.msk.f32.gmra.mrb[44].mxu1 %vm2541_vm9, %v2539_v42 }
 0x3f6   : > { %2785 = vmatprep.mubr.f32.mxu1 %v3713_v1 }
 0x3f9   : > { %3165 = vmatmul.mubr.msk.f32.gmra.mrb[46].mxu1 %vm2541_vm9, %v2540_v43 }
 0x490   : > { %v2632_v44 = vpop.f32.mrb[16].mxu1 }
 0x491   : > { %2792 = vst [vmem:[%s4222_s11] sm:$0xff] %v2632_v44  ;;  %v2634_v1 = vpop.f32.mrb[17].mxu1 }
 0x492   : > { %2793 = vst [vmem:[%s4222_s11 + $0x8] sm:$0xff] %v2634_v1 }
 0x494   : > { %v2638_v46 = vpop.f32.mrb[18].mxu1 }
 0x495   : > { %2796 = vst [vmem:[%s4222_s11 + $0x20] sm:$0xff] %v2638_v46  ;;  %v2640_v34 = vpop.f32.mrb[19].mxu1 }
 0x496   : > { %2797 = vst [vmem:[%s4222_s11 + $0x28] sm:$0xff] %v2640_v34 }
 0x498   : > { %v2644_v47 = vpop.f32.mrb[20].mxu1 }
 0x499   : > { %2800 = vst [vmem:[%s4222_s11 + $0x40] sm:$0xff] %v2644_v47  ;;  %v2646_v48 = vpop.f32.mrb[21].mxu1 }
 0x49a   : > { %2801 = vst [vmem:[%s4222_s11 + $0x48] sm:$0xff] %v2646_v48 }
 0x49c   : > { %v2650_v49 = vpop.f32.mrb[22].mxu1 }
 0x49d   : > { %2804 = vst [vmem:[%s4222_s11 + $0x60] sm:$0xff] %v2650_v49  ;;  %v2652_v50 = vpop.f32.mrb[23].mxu1 }
 0x49e   : > { %2805 = vst [vmem:[%s4222_s11 + $0x68] sm:$0xff] %v2652_v50 }
 0x4a0   : > { %v2656_v51 = vpop.f32.mrb[24].mxu1 }
 0x4a1   : > { %2808 = vst [vmem:[%s4222_s11 + $0x80] sm:$0xff] %v2656_v51  ;;  %v2658_v52 = vpop.f32.mrb[25].mxu1 }
 0x4a2   : > { %2809 = vst [vmem:[%s4222_s11 + $0x88] sm:$0xff] %v2658_v52 }
 0x4a4   : > { %v2662_v53 = vpop.f32.mrb[26].mxu1 }
 0x4a5   : > { %2812 = vst [vmem:[%s4222_s11 + $0xa0] sm:$0xff] %v2662_v53  ;;  %v2664_v54 = vpop.f32.mrb[27].mxu1 }
 0x4a6   : > { %2813 = vst [vmem:[%s4222_s11 + $0xa8] sm:$0xff] %v2664_v54 }
 0x4a8   : > { %v2668_v55 = vpop.f32.mrb[28].mxu1 }
 0x4a9   : > { %2816 = vst [vmem:[%s4222_s11 + $0xc0] sm:$0xff] %v2668_v55  ;;  %v2670_v56 = vpop.f32.mrb[29].mxu1 }
 0x4aa   : > { %2817 = vst [vmem:[%s4222_s11 + $0xc8] sm:$0xff] %v2670_v56 }
 0x4ac   : > { %v2674_v20 = vpop.f32.mrb[30].mxu1 }
 0x4ad   : > { %2820 = vst [vmem:[%s4222_s11 + $0xe0] sm:$0xff] %v2674_v20  ;;  %v2676_v57 = vpop.f32.mrb[31].mxu1 }
 0x4ae   : > { %2821 = vst [vmem:[%s4222_s11 + $0xe8] sm:$0xff] %v2676_v57 }
 0x4b0   : > { %v2745_v59 = vpop.f32.mrb[32].mxu1 }
 0x4b1   : > { %2794 = vst [vmem:[%s4222_s11 + $0x10] sm:$0xff] %v2745_v59  ;;  %v2747_v60 = vpop.f32.mrb[33].mxu1 }
 0x4b2   : > { %2795 = vst [vmem:[%s4222_s11 + $0x18] sm:$0xff] %v2747_v60 }
 0x4b4   : > { %v2751_v41 = vpop.f32.mrb[34].mxu1 }
 0x4b5   : > { %2798 = vst [vmem:[%s4222_s11 + $0x30] sm:$0xff] %v2751_v41  ;;  %v2753_v58 = vpop.f32.mrb[35].mxu1 }
 0x4b6   : > { %2799 = vst [vmem:[%s4222_s11 + $0x38] sm:$0xff] %v2753_v58 }
 0x4b8   : > { %v2757_v31 = vpop.f32.mrb[36].mxu1 }
 0x4b9   : > { %2802 = vst [vmem:[%s4222_s11 + $0x50] sm:$0xff] %v2757_v31  ;;  %v2759_v0 = vpop.f32.mrb[37].mxu1 }
 0x4ba   : > { %2803 = vst [vmem:[%s4222_s11 + $0x58] sm:$0xff] %v2759_v0 }
 0x4bc   : > { %v2763_v3 = vpop.f32.mrb[38].mxu1 }
 0x4bd   : > { %2806 = vst [vmem:[%s4222_s11 + $0x70] sm:$0xff] %v2763_v3  ;;  %v2765_v6 = vpop.f32.mrb[39].mxu1 }
 0x4be   : > { %2807 = vst [vmem:[%s4222_s11 + $0x78] sm:$0xff] %v2765_v6 }
 0x4c0   : > { %v2769_v27 = vpop.f32.mrb[40].mxu1 }
 0x4c1   : > { %2810 = vst [vmem:[%s4222_s11 + $0x90] sm:$0xff] %v2769_v27  ;;  %v2771_v7 = vpop.f32.mrb[41].mxu1 }
 0x4c2   : > { %2811 = vst [vmem:[%s4222_s11 + $0x98] sm:$0xff] %v2771_v7 }
 0x4c4   : > { %v2775_v9 = vpop.f32.mrb[42].mxu1 }
 0x4c5   : > { %2814 = vst [vmem:[%s4222_s11 + $0xb0] sm:$0xff] %v2775_v9  ;;  %v2777_v30 = vpop.f32.mrb[43].mxu1 }
 0x4c6   : > { %2815 = vst [vmem:[%s4222_s11 + $0xb8] sm:$0xff] %v2777_v30 }
 0x4c8   : > { %v2781_v11 = vpop.f32.mrb[44].mxu1 }
 0x4c9   : > { %2818 = vst [vmem:[%s4222_s11 + $0xd0] sm:$0xff] %v2781_v11  ;;  %v2783_v12 = vpop.f32.mrb[45].mxu1 }
 0x4ca   : > { %2819 = vst [vmem:[%s4222_s11 + $0xd8] sm:$0xff] %v2783_v12 }
 0x4cc   : > { %v2787_v13 = vpop.f32.mrb[46].mxu1 }
 0x4cd   : > { %2822 = vst [vmem:[%s4222_s11 + $0xf0] sm:$0xff] %v2787_v13  ;;  %v2789_v14 = vpop.f32.mrb[47].mxu1 }
 0x4ce   : > { %2823 = vst [vmem:[%s4222_s11 + $0xf8] sm:$0xff] %v2789_v14 }
 0x4cf PF: > { %s18_s24 = sadd.s32 1, %s3706_s24  }
 0x4d0   : > { %p15_p3 = scmp.ge.s32.totalorder %s18_s24, 4  }
 0x4d2   :  { %17 = sbr.rel (!%p15_p3) target bundleno = 1 (0x1), region = 87 }
 0x4d9   :  { %2845 = vsyncpa [#allocation5], 1 }
 0x4da   :  { %2847 = vsyncpa [#allocation5 + $0x1], 1 }

</bundles_post_ra>
